<compile_context>
chip_gen: v5e
topology: v5e:2x2
jax: 0.10.0
libtpu: 0.0.40
codegen_flags: <defaults>
</compile_context>

<pallas_src>
import numpy as np
import jax
import jax.numpy as jnp
from jax import lax
from jax.experimental import pallas as pl
from jax.experimental.pallas import tpu as pltpu

MRNA_LEN = 80
SEQ_LEN = 21
BIO_FEATS_DIM = 16
BATCH = 2

P_SI = SEQ_LEN // 2    # MaxPool1d(2) output length for siRNA (floor(21/2) = 10)
P_M = MRNA_LEN // 2    # MaxPool1d(2) output length for mRNA  (40)
PAD_SI = 16            # per-sample padded block: multiple of 8 and > P_SI
PAD_M = 48             # per-sample padded block: multiple of 8 and > P_M


# ----------------------------- Pallas kernel --------------------------------
def _make_kernel(B):
    RP_SI = B * PAD_SI
    RP_M = B * PAD_M

    def branch(cols_ref, w1_ref, w2_ref, widx, b1, b2, RP, P, P_pad):
        """Conv1d(k=3,p=1)+ReLU -> MaxPool1d(2) -> Conv1d(k=3,p=1)+ReLU ->
        AdaptiveMaxPool1d(1), batched over all samples.  Returns (B, 64) f32."""
        # Conv1: single merged even/odd im2col matmul (K=12), shared weight.
        w1 = w1_ref[widx]                                                  # (12,32) bf16
        h = jnp.dot(cols_ref[...], w1, preferred_element_type=jnp.float32)  # (2RP,32)
        # relu(max(even,odd)+b) == max(relu(even+b),relu(odd+b))  => pool fused in.
        pooled = jnp.maximum(jnp.maximum(h[:RP], h[RP:]) + b1, 0.0)        # (RP,32) f32

        # Zero the per-sample padded rows: gives conv2 its zero padding (rolled
        # reads land on these rows) and keeps them out of the global max.
        row = lax.broadcasted_iota(jnp.int32, (RP, 1), 0)
        valid = (row % P_pad) < P
        pooled = jnp.where(valid, pooled, 0.0)

        # Conv2 taps via XLU sublane rotations (circular wrap hits zeroed pad rows
        # because P_pad > P for every sample block).
        prev = pltpu.roll(pooled, shift=1, axis=0)        # prev[p] = pooled[p-1]
        nxt = pltpu.roll(pooled, shift=RP - 1, axis=0)    # nxt[p]  = pooled[p+1]
        acc = jnp.dot(prev.astype(jnp.bfloat16), w2_ref[widx, 0],
                      preferred_element_type=jnp.float32)
        acc = acc + jnp.dot(pooled.astype(jnp.bfloat16), w2_ref[widx, 1],
                            preferred_element_type=jnp.float32)
        acc = acc + jnp.dot(nxt.astype(jnp.bfloat16), w2_ref[widx, 2],
                            preferred_element_type=jnp.float32)
        h2 = jnp.maximum(acc + b2, 0.0)                                    # (RP,64)
        h2 = jnp.where(valid, h2, 0.0)          # ReLU >= 0, so 0 is neutral for max

        # AdaptiveMaxPool1d(1): per-sample global max (P_pad is a multiple of 8,
        # so the reshape only splits the sublane axis on a tile boundary).
        return jnp.max(h2.reshape(B, P_pad, 64), axis=1)                   # (B,64)

    def kernel(cols_si_ref, cols_m_ref, extra_ref,
               w1_ref, w2_ref, wl1sm_ref, wl1x_ref,
               wl2_ref, wl3_ref, wl4_ref, wl5_ref, b_ref, out_ref):
        # Packed biases (one DMA); static row / lane-0 slices are free.
        b1s = b_ref[0:1, 0:32]
        b2s = b_ref[1:2, 0:64]
        b1m = b_ref[2:3, 0:32]
        b2m = b_ref[3:4, 0:64]
        bl1 = b_ref[4:5, 0:256]
        bl2 = b_ref[5:6, 0:128]
        bl3 = b_ref[6:7, 0:64]
        bl4 = b_ref[7:8, 0:32]
        bl5 = b_ref[8:9, 0:1]

        feat_si = branch(cols_si_ref, w1_ref, w2_ref, 0, b1s, b2s, RP_SI, P_SI, PAD_SI)
        feat_m = branch(cols_m_ref, w1_ref, w2_ref, 1, b1m, b2m, RP_M, P_M, PAD_M)

        # MLP: torch.cat([si, m, extra], 1) @ W1 as a split matmul (same math).
        # Dropout layers are identity (eval mode).
        h = (jnp.dot(feat_si.astype(jnp.bfloat16), wl1sm_ref[0],
                     preferred_element_type=jnp.float32)
             + jnp.dot(feat_m.astype(jnp.bfloat16), wl1sm_ref[1],
                       preferred_element_type=jnp.float32)
             + jnp.dot(extra_ref[...], wl1x_ref[...],
                       preferred_element_type=jnp.float32)
             + bl1)
        h = jnp.maximum(h, 0.0)
        h = jnp.maximum(jnp.dot(h.astype(jnp.bfloat16), wl2_ref[...],
                                preferred_element_type=jnp.float32) + bl2, 0.0)
        h = jnp.maximum(jnp.dot(h.astype(jnp.bfloat16), wl3_ref[...],
                                preferred_element_type=jnp.float32) + bl3, 0.0)
        h = jnp.maximum(jnp.dot(h.astype(jnp.bfloat16), wl4_ref[...],
                                preferred_element_type=jnp.float32) + bl4, 0.0)
        z = jnp.dot(h.astype(jnp.bfloat16), wl5_ref[...],
                    preferred_element_type=jnp.float32) + bl5              # (B,1)
        # Sigmoid: exp on EUP + approx reciprocal (vrcp, EUP slot).
        out_ref[...] = pl.reciprocal(1.0 + jnp.exp(-z), approx=True)

    return kernel


# ------------------------------ wrapper (glue) -------------------------------
def _im2col_merged(seq, L, P, P_pad):
    """seq (B,L,4) f32 -> (2*B*P_pad, 12) bf16 with the even-position im2col rows
    of every sample first, then the odd-position rows; each per-sample block is
    zero-padded from P to P_pad rows."""
    B = seq.shape[0]
    pad = jnp.pad(seq, ((0, 0), (1, 1), (0, 0)))
    col = jnp.concatenate([pad[:, t:t + L, :] for t in range(3)], axis=-1)   # (B,L,12)
    even = jnp.pad(col[:, 0:2 * P:2, :], ((0, 0), (0, P_pad - P), (0, 0)))
    odd = jnp.pad(col[:, 1:2 * P:2, :], ((0, 0), (0, P_pad - P), (0, 0)))
    both = jnp.concatenate([even, odd], axis=0)                              # (2B,P_pad,12)
    return both.reshape(2 * B * P_pad, 12).astype(jnp.bfloat16)


def _pack_biases(biases, width=256):
    rows = [jnp.pad(jnp.asarray(b, jnp.float32).reshape(-1), (0, width - b.size))
            for b in biases]
    return jnp.stack(rows)                                                   # (9,256) f32


def ann_forward(x, params):
    B = x.shape[0]
    x = x.astype(jnp.float32)
    si = x[:, :SEQ_LEN * 4].reshape(B, SEQ_LEN, 4)          # == torch .view(B, 21, 4)
    m = x[:, SEQ_LEN * 4:SEQ_LEN * 4 + MRNA_LEN * 4].reshape(B, MRNA_LEN, 4)
    extra = x[:, SEQ_LEN * 4 + MRNA_LEN * 4:]
    bio = extra.shape[1]

    cols_si = _im2col_merged(si, SEQ_LEN, P_SI, PAD_SI)     # (2*B*16, 12) bf16
    cols_m = _im2col_merged(m, MRNA_LEN, P_M, PAD_M)        # (2*B*48, 12) bf16

    (w1s, b1s, w2s, b2s, w1m, b1m, w2m, b2m,
     wl1_si, wl1_m, wl1_x, bl1, wl2, bl2, wl3, bl3, wl4, bl4, wl5, bl5) = params

    bf = lambda a: a.astype(jnp.bfloat16)
    w1 = bf(jnp.stack([w1s.reshape(12, 32), w1m.reshape(12, 32)]))   # (2,12,32)
    w2 = bf(jnp.stack([w2s, w2m]))                                   # (2,3,32,64)
    wl1sm = bf(jnp.stack([wl1_si, wl1_m]))                           # (2,64,256)
    biases = _pack_biases([b1s, b2s, b1m, b2m, bl1, bl2, bl3, bl4, bl5])

    args = (cols_si, cols_m, bf(extra),
            w1, w2, wl1sm, bf(wl1_x), bf(wl2), bf(wl3), bf(wl4), bf(wl5), biases)

    vmem = pl.BlockSpec(memory_space=pltpu.MemorySpace.VMEM)
    flops = (2 * cols_si.shape[0] * 12 * 32 + 2 * 3 * B * PAD_SI * 32 * 64
             + 2 * cols_m.shape[0] * 12 * 32 + 2 * 3 * B * PAD_M * 32 * 64
             + 2 * B * (2 * 64 * 256 + bio * 256 + 256 * 128 + 128 * 64 + 64 * 32 + 32))
    bytes_accessed = sum(a.size * a.dtype.itemsize for a in args) + B * 4

    out = pl.pallas_call(
        _make_kernel(B),
        out_shape=jax.ShapeDtypeStruct((B, 1), jnp.float32),
        in_specs=[vmem] * len(args),
        out_specs=vmem,
        cost_estimate=pl.CostEstimate(flops=int(flops), transcendentals=B,
                                      bytes_accessed=int(bytes_accessed)),
    )(*args)
    return out[:, 0]                                        # == .squeeze(-1)


# ------------------------- deterministic parameters --------------------------
def init_params(key, bio_dim):
    keys = jax.random.split(key, 20)
    def nrm(k, shape, scale=0.1):
        return scale * jax.random.normal(k, shape, jnp.float32)
    w1s = nrm(keys[0], (3, 4, 32));    b1s = nrm(keys[1], (1, 32))
    w2s = nrm(keys[2], (3, 32, 64));   b2s = nrm(keys[3], (1, 64))
    w1m = nrm(keys[4], (3, 4, 32));    b1m = nrm(keys[5], (1, 32))
    w2m = nrm(keys[6], (3, 32, 64));   b2m = nrm(keys[7], (1, 64))
    wl1_si = nrm(keys[8], (64, 256));  wl1_m = nrm(keys[9], (64, 256))
    wl1_x = nrm(keys[10], (bio_dim, 256)); bl1 = nrm(keys[11], (1, 256))
    wl2 = nrm(keys[12], (256, 128));   bl2 = nrm(keys[13], (1, 128))
    wl3 = nrm(keys[14], (128, 64));    bl3 = nrm(keys[15], (1, 64))
    wl4 = nrm(keys[16], (64, 32));     bl4 = nrm(keys[17], (1, 32))
    wl5 = nrm(keys[18], (32, 1));      bl5 = nrm(keys[19], (1, 1))
    return (w1s, b1s, w2s, b2s, w1m, b1m, w2m, b2m,
            wl1_si, wl1_m, wl1_x, bl1, wl2, bl2, wl3, bl3, wl4, bl4, wl5, bl5)


# -------------------------- pure-JAX reference -------------------------------
def ann_reference(x, params):
    (w1s, b1s, w2s, b2s, w1m, b1m, w2m, b2m,
     wl1_si, wl1_m, wl1_x, bl1, wl2, bl2, wl3, bl3, wl4, bl4, wl5, bl5) = params
    B = x.shape[0]
    x = x.astype(jnp.float32)
    si = x[:, :SEQ_LEN * 4].reshape(B, SEQ_LEN, 4)
    m = x[:, SEQ_LEN * 4:SEQ_LEN * 4 + MRNA_LEN * 4].reshape(B, MRNA_LEN, 4)
    extra = x[:, SEQ_LEN * 4 + MRNA_LEN * 4:]

    def branch(seq, w1, b1, w2, b2):
        L = seq.shape[1]; P = L // 2
        p = jnp.pad(seq, ((0, 0), (1, 1), (0, 0)))
        h = sum(jnp.einsum('blc,cd->bld', p[:, t:t + L, :], w1[t]) for t in range(3)) + b1
        h = jnp.maximum(h, 0.0)
        h = jnp.maximum(h[:, 0:2 * P:2, :], h[:, 1:2 * P + 1:2, :])   # MaxPool1d(2)
        p2 = jnp.pad(h, ((0, 0), (1, 1), (0, 0)))
        h2 = sum(jnp.einsum('blc,cd->bld', p2[:, t:t + P, :], w2[t]) for t in range(3)) + b2
        h2 = jnp.maximum(h2, 0.0)
        return jnp.max(h2, axis=1)                                    # AdaptiveMaxPool1d(1)

    fs = branch(si, w1s, b1s, w2s, b2s)
    fm = branch(m, w1m, b1m, w2m, b2m)
    h = jnp.maximum(fs @ wl1_si + fm @ wl1_m + extra @ wl1_x + bl1, 0.0)
    h = jnp.maximum(h @ wl2 + bl2, 0.0)
    h = jnp.maximum(h @ wl3 + bl3, 0.0)
    h = jnp.maximum(h @ wl4 + bl4, 0.0)
    z = h @ wl5 + bl5
    return (1.0 / (1.0 + jnp.exp(-z)))[:, 0]


if __name__ == "__main__":
    key = jax.random.PRNGKey(0)
    kx, kp = jax.random.split(key)
    in_dim = SEQ_LEN * 4 + MRNA_LEN * 4 + BIO_FEATS_DIM      # 84 + 320 + 16 = 420
    x = jax.random.normal(kx, (BATCH, in_dim), jnp.float32)
    params = init_params(kp, BIO_FEATS_DIM)

    fwd = jax.jit(ann_forward)
    out = jax.block_until_ready(fwd(x, params))
    assert out.shape == (BATCH,), out.shape

    ref = ann_reference(x, params)
    # bf16 MXU inputs + approx reciprocal: compare at bf16-level tolerance.
    np.testing.assert_allclose(np.asarray(out), np.asarray(ref), atol=2e-2, rtol=2e-2)
    print("KERNEL_OK")
</pallas_src>

<mosaic_0001>
module attributes {stable_mosaic.version = 11 : i64} {
  func.func @kernel(%arg0: memref<64x12xbf16, #tpu.memory_space<vmem>>, %arg1: memref<192x12xbf16, #tpu.memory_space<vmem>>, %arg2: memref<2x16xbf16, #tpu.memory_space<vmem>>, %arg3: memref<2x12x32xbf16, #tpu.memory_space<vmem>>, %arg4: memref<2x3x32x64xbf16, #tpu.memory_space<vmem>>, %arg5: memref<2x64x256xbf16, #tpu.memory_space<vmem>>, %arg6: memref<16x256xbf16, #tpu.memory_space<vmem>>, %arg7: memref<256x128xbf16, #tpu.memory_space<vmem>>, %arg8: memref<128x64xbf16, #tpu.memory_space<vmem>>, %arg9: memref<64x32xbf16, #tpu.memory_space<vmem>>, %arg10: memref<32x1xbf16, #tpu.memory_space<vmem>>, %arg11: memref<9x256xf32, #tpu.memory_space<vmem>>, %arg12: memref<2x1xf32, #tpu.memory_space<vmem>>) attributes {dimension_semantics = [], scalar_prefetch = 0 : i64, scratch_operands = 0 : i64, tpu.core_type = #tpu.core_type<tc>} {
    %c0 = arith.constant 0 : index
    %c0_0 = arith.constant 0 : index
    %0 = vector.load %arg11[%c0, %c0_0] : memref<9x256xf32, #tpu.memory_space<vmem>>, vector<1x32xf32>
    %c1 = arith.constant 1 : index
    %c0_1 = arith.constant 0 : index
    %1 = vector.load %arg11[%c1, %c0_1] : memref<9x256xf32, #tpu.memory_space<vmem>>, vector<1x64xf32>
    %c2 = arith.constant 2 : index
    %c0_2 = arith.constant 0 : index
    %2 = vector.load %arg11[%c2, %c0_2] : memref<9x256xf32, #tpu.memory_space<vmem>>, vector<1x32xf32>
    %c3 = arith.constant 3 : index
    %c0_3 = arith.constant 0 : index
    %3 = vector.load %arg11[%c3, %c0_3] : memref<9x256xf32, #tpu.memory_space<vmem>>, vector<1x64xf32>
    %c4 = arith.constant 4 : index
    %c0_4 = arith.constant 0 : index
    %4 = vector.load %arg11[%c4, %c0_4] : memref<9x256xf32, #tpu.memory_space<vmem>>, vector<1x256xf32>
    %c5 = arith.constant 5 : index
    %c0_5 = arith.constant 0 : index
    %5 = vector.load %arg11[%c5, %c0_5] : memref<9x256xf32, #tpu.memory_space<vmem>>, vector<1x128xf32>
    %c6 = arith.constant 6 : index
    %c0_6 = arith.constant 0 : index
    %6 = vector.load %arg11[%c6, %c0_6] : memref<9x256xf32, #tpu.memory_space<vmem>>, vector<1x64xf32>
    %c7 = arith.constant 7 : index
    %c0_7 = arith.constant 0 : index
    %7 = vector.load %arg11[%c7, %c0_7] : memref<9x256xf32, #tpu.memory_space<vmem>>, vector<1x32xf32>
    %c8 = arith.constant 8 : index
    %c0_8 = arith.constant 0 : index
    %8 = vector.load %arg11[%c8, %c0_8] : memref<9x256xf32, #tpu.memory_space<vmem>>, vector<1x1xf32>
    %c0_9 = arith.constant 0 : index
    %c0_10 = arith.constant 0 : index
    %c0_11 = arith.constant 0 : index
    %9 = vector.load %arg3[%c0_9, %c0_10, %c0_11] : memref<2x12x32xbf16, #tpu.memory_space<vmem>>, vector<1x12x32xbf16>
    %10 = vector.shape_cast %9 : vector<1x12x32xbf16> to vector<12x32xbf16>
    %c0_12 = arith.constant 0 : index
    %c0_13 = arith.constant 0 : index
    %11 = vector.load %arg0[%c0_12, %c0_13] : memref<64x12xbf16, #tpu.memory_space<vmem>>, vector<64x12xbf16>
    %cst = arith.constant dense<0.000000e+00> : vector<64x32xf32>
    %12 = tpu.matmul %11, %10, %cst {dimension_numbers = #tpu.dot_dimension_numbers<[1], [0], [0], [1], [0, 0, 1, 1], [], []>} : vector<64x12xbf16>, vector<12x32xbf16>, vector<64x32xf32> -> vector<64x32xf32>
    %13 = vector.extract_strided_slice %12 {offsets = [0, 0], sizes = [32, 32], strides = [1, 1]} : vector<64x32xf32> to vector<32x32xf32>
    %14 = vector.extract_strided_slice %12 {offsets = [32, 0], sizes = [32, 32], strides = [1, 1]} : vector<64x32xf32> to vector<32x32xf32>
    %15 = arith.maximumf %13, %14 : vector<32x32xf32>
    %16 = vector.broadcast %0 : vector<1x32xf32> to vector<32x32xf32>
    %17 = arith.addf %15, %16 : vector<32x32xf32>
    %cst_14 = arith.constant 0.000000e+00 : f32
    %18 = vector.broadcast %cst_14 : f32 to vector<32x32xf32>
    %19 = arith.maximumf %17, %18 : vector<32x32xf32>
    %20 = tpu.iota {dimensions = array<i32: 0>} : vector<32x1xi32>
    %c16_i32 = arith.constant 16 : i32
    %c0_i32 = arith.constant 0 : i32
    %21 = arith.cmpi eq, %c16_i32, %c0_i32 : i32
    %c1_i32 = arith.constant 1 : i32
    %22 = arith.select %21, %c1_i32, %c16_i32 : i32
    %23 = vector.broadcast %22 : i32 to vector<32x1xi32>
    %24 = arith.remsi %20, %23 : vector<32x1xi32>
    %c0_i32_15 = arith.constant 0 : i32
    %25 = vector.broadcast %c0_i32_15 : i32 to vector<32x1xi32>
    %26 = arith.cmpi ne, %24, %25 : vector<32x1xi32>
    %c0_i32_16 = arith.constant 0 : i32
    %27 = vector.broadcast %c0_i32_16 : i32 to vector<32x1xi32>
    %28 = arith.cmpi slt, %24, %27 : vector<32x1xi32>
    %c0_i32_17 = arith.constant 0 : i32
    %29 = arith.cmpi slt, %22, %c0_i32_17 : i32
    %30 = vector.broadcast %29 : i1 to vector<32x1xi1>
    %31 = vector.broadcast %30 : vector<32x1xi1> to vector<32x1xi1>
    %32 = arith.xori %28, %31 : vector<32x1xi1>
    %33 = arith.andi %32, %26 : vector<32x1xi1>
    %34 = vector.broadcast %22 : i32 to vector<32x1xi32>
    %35 = arith.addi %24, %34 : vector<32x1xi32>
    %36 = arith.select %33, %35, %24 : vector<32x1xi1>, vector<32x1xi32>
    %c10_i32 = arith.constant 10 : i32
    %37 = vector.broadcast %c10_i32 : i32 to vector<32x1xi32>
    %38 = arith.cmpi slt, %36, %37 : vector<32x1xi32>
    %cst_18 = arith.constant 0.000000e+00 : f32
    %39 = vector.shape_cast %38 : vector<32x1xi1> to vector<32x1xi1>
    %40 = vector.broadcast %39 : vector<32x1xi1> to vector<32x32xi1>
    %41 = vector.broadcast %cst_18 : f32 to vector<32x32xf32>
    %42 = arith.select %40, %19, %41 : vector<32x32xi1>, vector<32x32xf32>
    %c1_i32_19 = arith.constant 1 : i32
    %43 = tpu.dynamic_rotate %42 by %c1_i32_19 dim 0 : vector<32x32xf32>, i32 -> vector<32x32xf32>
    %c31_i32 = arith.constant 31 : i32
    %44 = tpu.dynamic_rotate %42 by %c31_i32 dim 0 : vector<32x32xf32>, i32 -> vector<32x32xf32>
    %45 = arith.truncf %43 : vector<32x32xf32> to vector<32x32xbf16>
    %c0_20 = arith.constant 0 : index
    %c0_21 = arith.constant 0 : index
    %c0_22 = arith.constant 0 : index
    %c0_23 = arith.constant 0 : index
    %46 = vector.load %arg4[%c0_20, %c0_21, %c0_22, %c0_23] : memref<2x3x32x64xbf16, #tpu.memory_space<vmem>>, vector<1x1x32x64xbf16>
    %47 = vector.shape_cast %46 : vector<1x1x32x64xbf16> to vector<32x64xbf16>
    %cst_24 = arith.constant dense<0.000000e+00> : vector<32x64xf32>
    %48 = tpu.matmul %45, %47, %cst_24 {dimension_numbers = #tpu.dot_dimension_numbers<[1], [0], [0], [1], [0, 0, 1, 1], [], []>} : vector<32x32xbf16>, vector<32x64xbf16>, vector<32x64xf32> -> vector<32x64xf32>
    %49 = arith.truncf %42 : vector<32x32xf32> to vector<32x32xbf16>
    %c0_25 = arith.constant 0 : index
    %c1_26 = arith.constant 1 : index
    %c0_27 = arith.constant 0 : index
    %c0_28 = arith.constant 0 : index
    %50 = vector.load %arg4[%c0_25, %c1_26, %c0_27, %c0_28] : memref<2x3x32x64xbf16, #tpu.memory_space<vmem>>, vector<1x1x32x64xbf16>
    %51 = vector.shape_cast %50 : vector<1x1x32x64xbf16> to vector<32x64xbf16>
    %cst_29 = arith.constant dense<0.000000e+00> : vector<32x64xf32>
    %52 = tpu.matmul %49, %51, %cst_29 {dimension_numbers = #tpu.dot_dimension_numbers<[1], [0], [0], [1], [0, 0, 1, 1], [], []>} : vector<32x32xbf16>, vector<32x64xbf16>, vector<32x64xf32> -> vector<32x64xf32>
    %53 = arith.addf %48, %52 : vector<32x64xf32>
    %54 = arith.truncf %44 : vector<32x32xf32> to vector<32x32xbf16>
    %c0_30 = arith.constant 0 : index
    %c2_31 = arith.constant 2 : index
    %c0_32 = arith.constant 0 : index
    %c0_33 = arith.constant 0 : index
    %55 = vector.load %arg4[%c0_30, %c2_31, %c0_32, %c0_33] : memref<2x3x32x64xbf16, #tpu.memory_space<vmem>>, vector<1x1x32x64xbf16>
    %56 = vector.shape_cast %55 : vector<1x1x32x64xbf16> to vector<32x64xbf16>
    %cst_34 = arith.constant dense<0.000000e+00> : vector<32x64xf32>
    %57 = tpu.matmul %54, %56, %cst_34 {dimension_numbers = #tpu.dot_dimension_numbers<[1], [0], [0], [1], [0, 0, 1, 1], [], []>} : vector<32x32xbf16>, vector<32x64xbf16>, vector<32x64xf32> -> vector<32x64xf32>
    %58 = arith.addf %53, %57 : vector<32x64xf32>
    %59 = vector.broadcast %1 : vector<1x64xf32> to vector<32x64xf32>
    %60 = arith.addf %58, %59 : vector<32x64xf32>
    %cst_35 = arith.constant 0.000000e+00 : f32
    %61 = vector.broadcast %cst_35 : f32 to vector<32x64xf32>
    %62 = arith.maximumf %60, %61 : vector<32x64xf32>
    %cst_36 = arith.constant 0.000000e+00 : f32
    %63 = vector.shape_cast %38 : vector<32x1xi1> to vector<32x1xi1>
    %64 = vector.broadcast %63 : vector<32x1xi1> to vector<32x64xi1>
    %65 = vector.broadcast %cst_36 : f32 to vector<32x64xf32>
    %66 = arith.select %64, %62, %65 : vector<32x64xi1>, vector<32x64xf32>
    %67 = vector.shape_cast %66 : vector<32x64xf32> to vector<2x16x64xf32>
    %cst_37 = arith.constant dense<0xFF800000> : vector<2x64xf32>
    %68 = vector.multi_reduction <maximumf>, %67, %cst_37 [1] : vector<2x16x64xf32> to vector<2x64xf32>
    %c1_38 = arith.constant 1 : index
    %c0_39 = arith.constant 0 : index
    %c0_40 = arith.constant 0 : index
    %69 = vector.load %arg3[%c1_38, %c0_39, %c0_40] : memref<2x12x32xbf16, #tpu.memory_space<vmem>>, vector<1x12x32xbf16>
    %70 = vector.shape_cast %69 : vector<1x12x32xbf16> to vector<12x32xbf16>
    %c0_41 = arith.constant 0 : index
    %c0_42 = arith.constant 0 : index
    %71 = vector.load %arg1[%c0_41, %c0_42] : memref<192x12xbf16, #tpu.memory_space<vmem>>, vector<192x12xbf16>
    %cst_43 = arith.constant dense<0.000000e+00> : vector<192x32xf32>
    %72 = tpu.matmul %71, %70, %cst_43 {dimension_numbers = #tpu.dot_dimension_numbers<[1], [0], [0], [1], [0, 0, 1, 1], [], []>} : vector<192x12xbf16>, vector<12x32xbf16>, vector<192x32xf32> -> vector<192x32xf32>
    %73 = vector.extract_strided_slice %72 {offsets = [0, 0], sizes = [96, 32], strides = [1, 1]} : vector<192x32xf32> to vector<96x32xf32>
    %74 = vector.extract_strided_slice %72 {offsets = [96, 0], sizes = [96, 32], strides = [1, 1]} : vector<192x32xf32> to vector<96x32xf32>
    %75 = arith.maximumf %73, %74 : vector<96x32xf32>
    %76 = vector.broadcast %2 : vector<1x32xf32> to vector<96x32xf32>
    %77 = arith.addf %75, %76 : vector<96x32xf32>
    %cst_44 = arith.constant 0.000000e+00 : f32
    %78 = vector.broadcast %cst_44 : f32 to vector<96x32xf32>
    %79 = arith.maximumf %77, %78 : vector<96x32xf32>
    %80 = tpu.iota {dimensions = array<i32: 0>} : vector<96x1xi32>
    %c48_i32 = arith.constant 48 : i32
    %c0_i32_45 = arith.constant 0 : i32
    %81 = arith.cmpi eq, %c48_i32, %c0_i32_45 : i32
    %c1_i32_46 = arith.constant 1 : i32
    %82 = arith.select %81, %c1_i32_46, %c48_i32 : i32
    %83 = vector.broadcast %82 : i32 to vector<96x1xi32>
    %84 = arith.remsi %80, %83 : vector<96x1xi32>
    %c0_i32_47 = arith.constant 0 : i32
    %85 = vector.broadcast %c0_i32_47 : i32 to vector<96x1xi32>
    %86 = arith.cmpi ne, %84, %85 : vector<96x1xi32>
    %c0_i32_48 = arith.constant 0 : i32
    %87 = vector.broadcast %c0_i32_48 : i32 to vector<96x1xi32>
    %88 = arith.cmpi slt, %84, %87 : vector<96x1xi32>
    %c0_i32_49 = arith.constant 0 : i32
    %89 = arith.cmpi slt, %82, %c0_i32_49 : i32
    %90 = vector.broadcast %89 : i1 to vector<96x1xi1>
    %91 = vector.broadcast %90 : vector<96x1xi1> to vector<96x1xi1>
    %92 = arith.xori %88, %91 : vector<96x1xi1>
    %93 = arith.andi %92, %86 : vector<96x1xi1>
    %94 = vector.broadcast %82 : i32 to vector<96x1xi32>
    %95 = arith.addi %84, %94 : vector<96x1xi32>
    %96 = arith.select %93, %95, %84 : vector<96x1xi1>, vector<96x1xi32>
    %c40_i32 = arith.constant 40 : i32
    %97 = vector.broadcast %c40_i32 : i32 to vector<96x1xi32>
    %98 = arith.cmpi slt, %96, %97 : vector<96x1xi32>
    %cst_50 = arith.constant 0.000000e+00 : f32
    %99 = vector.shape_cast %98 : vector<96x1xi1> to vector<96x1xi1>
    %100 = vector.broadcast %99 : vector<96x1xi1> to vector<96x32xi1>
    %101 = vector.broadcast %cst_50 : f32 to vector<96x32xf32>
    %102 = arith.select %100, %79, %101 : vector<96x32xi1>, vector<96x32xf32>
    %c1_i32_51 = arith.constant 1 : i32
    %103 = tpu.dynamic_rotate %102 by %c1_i32_51 dim 0 : vector<96x32xf32>, i32 -> vector<96x32xf32>
    %c95_i32 = arith.constant 95 : i32
    %104 = tpu.dynamic_rotate %102 by %c95_i32 dim 0 : vector<96x32xf32>, i32 -> vector<96x32xf32>
    %105 = arith.truncf %103 : vector<96x32xf32> to vector<96x32xbf16>
    %c1_52 = arith.constant 1 : index
    %c0_53 = arith.constant 0 : index
    %c0_54 = arith.constant 0 : index
    %c0_55 = arith.constant 0 : index
    %106 = vector.load %arg4[%c1_52, %c0_53, %c0_54, %c0_55] : memref<2x3x32x64xbf16, #tpu.memory_space<vmem>>, vector<1x1x32x64xbf16>
    %107 = vector.shape_cast %106 : vector<1x1x32x64xbf16> to vector<32x64xbf16>
    %cst_56 = arith.constant dense<0.000000e+00> : vector<96x64xf32>
    %108 = tpu.matmul %105, %107, %cst_56 {dimension_numbers = #tpu.dot_dimension_numbers<[1], [0], [0], [1], [0, 0, 1, 1], [], []>} : vector<96x32xbf16>, vector<32x64xbf16>, vector<96x64xf32> -> vector<96x64xf32>
    %109 = arith.truncf %102 : vector<96x32xf32> to vector<96x32xbf16>
    %c1_57 = arith.constant 1 : index
    %c1_58 = arith.constant 1 : index
    %c0_59 = arith.constant 0 : index
    %c0_60 = arith.constant 0 : index
    %110 = vector.load %arg4[%c1_57, %c1_58, %c0_59, %c0_60] : memref<2x3x32x64xbf16, #tpu.memory_space<vmem>>, vector<1x1x32x64xbf16>
    %111 = vector.shape_cast %110 : vector<1x1x32x64xbf16> to vector<32x64xbf16>
    %cst_61 = arith.constant dense<0.000000e+00> : vector<96x64xf32>
    %112 = tpu.matmul %109, %111, %cst_61 {dimension_numbers = #tpu.dot_dimension_numbers<[1], [0], [0], [1], [0, 0, 1, 1], [], []>} : vector<96x32xbf16>, vector<32x64xbf16>, vector<96x64xf32> -> vector<96x64xf32>
    %113 = arith.addf %108, %112 : vector<96x64xf32>
    %114 = arith.truncf %104 : vector<96x32xf32> to vector<96x32xbf16>
    %c1_62 = arith.constant 1 : index
    %c2_63 = arith.constant 2 : index
    %c0_64 = arith.constant 0 : index
    %c0_65 = arith.constant 0 : index
    %115 = vector.load %arg4[%c1_62, %c2_63, %c0_64, %c0_65] : memref<2x3x32x64xbf16, #tpu.memory_space<vmem>>, vector<1x1x32x64xbf16>
    %116 = vector.shape_cast %115 : vector<1x1x32x64xbf16> to vector<32x64xbf16>
    %cst_66 = arith.constant dense<0.000000e+00> : vector<96x64xf32>
    %117 = tpu.matmul %114, %116, %cst_66 {dimension_numbers = #tpu.dot_dimension_numbers<[1], [0], [0], [1], [0, 0, 1, 1], [], []>} : vector<96x32xbf16>, vector<32x64xbf16>, vector<96x64xf32> -> vector<96x64xf32>
    %118 = arith.addf %113, %117 : vector<96x64xf32>
    %119 = vector.broadcast %3 : vector<1x64xf32> to vector<96x64xf32>
    %120 = arith.addf %118, %119 : vector<96x64xf32>
    %cst_67 = arith.constant 0.000000e+00 : f32
    %121 = vector.broadcast %cst_67 : f32 to vector<96x64xf32>
    %122 = arith.maximumf %120, %121 : vector<96x64xf32>
    %cst_68 = arith.constant 0.000000e+00 : f32
    %123 = vector.shape_cast %98 : vector<96x1xi1> to vector<96x1xi1>
    %124 = vector.broadcast %123 : vector<96x1xi1> to vector<96x64xi1>
    %125 = vector.broadcast %cst_68 : f32 to vector<96x64xf32>
    %126 = arith.select %124, %122, %125 : vector<96x64xi1>, vector<96x64xf32>
    %127 = vector.shape_cast %126 : vector<96x64xf32> to vector<2x48x64xf32>
    %cst_69 = arith.constant dense<0xFF800000> : vector<2x64xf32>
    %128 = vector.multi_reduction <maximumf>, %127, %cst_69 [1] : vector<2x48x64xf32> to vector<2x64xf32>
    %129 = arith.truncf %68 : vector<2x64xf32> to vector<2x64xbf16>
    %c0_70 = arith.constant 0 : index
    %c0_71 = arith.constant 0 : index
    %c0_72 = arith.constant 0 : index
    %130 = vector.load %arg5[%c0_70, %c0_71, %c0_72] : memref<2x64x256xbf16, #tpu.memory_space<vmem>>, vector<1x64x256xbf16>
    %131 = vector.shape_cast %130 : vector<1x64x256xbf16> to vector<64x256xbf16>
    %cst_73 = arith.constant dense<0.000000e+00> : vector<2x256xf32>
    %132 = tpu.matmul %129, %131, %cst_73 {dimension_numbers = #tpu.dot_dimension_numbers<[1], [0], [0], [1], [0, 0, 1, 1], [], []>} : vector<2x64xbf16>, vector<64x256xbf16>, vector<2x256xf32> -> vector<2x256xf32>
    %133 = arith.truncf %128 : vector<2x64xf32> to vector<2x64xbf16>
    %c1_74 = arith.constant 1 : index
    %c0_75 = arith.constant 0 : index
    %c0_76 = arith.constant 0 : index
    %134 = vector.load %arg5[%c1_74, %c0_75, %c0_76] : memref<2x64x256xbf16, #tpu.memory_space<vmem>>, vector<1x64x256xbf16>
    %135 = vector.shape_cast %134 : vector<1x64x256xbf16> to vector<64x256xbf16>
    %cst_77 = arith.constant dense<0.000000e+00> : vector<2x256xf32>
    %136 = tpu.matmul %133, %135, %cst_77 {dimension_numbers = #tpu.dot_dimension_numbers<[1], [0], [0], [1], [0, 0, 1, 1], [], []>} : vector<2x64xbf16>, vector<64x256xbf16>, vector<2x256xf32> -> vector<2x256xf32>
    %137 = arith.addf %132, %136 : vector<2x256xf32>
    %c0_78 = arith.constant 0 : index
    %c0_79 = arith.constant 0 : index
    %138 = vector.load %arg2[%c0_78, %c0_79] : memref<2x16xbf16, #tpu.memory_space<vmem>>, vector<2x16xbf16>
    %c0_80 = arith.constant 0 : index
    %c0_81 = arith.constant 0 : index
    %139 = vector.load %arg6[%c0_80, %c0_81] : memref<16x256xbf16, #tpu.memory_space<vmem>>, vector<16x256xbf16>
    %cst_82 = arith.constant dense<0.000000e+00> : vector<2x256xf32>
    %140 = tpu.matmul %138, %139, %cst_82 {dimension_numbers = #tpu.dot_dimension_numbers<[1], [0], [0], [1], [0, 0, 1, 1], [], []>} : vector<2x16xbf16>, vector<16x256xbf16>, vector<2x256xf32> -> vector<2x256xf32>
    %141 = arith.addf %137, %140 : vector<2x256xf32>
    %142 = vector.broadcast %4 : vector<1x256xf32> to vector<2x256xf32>
    %143 = arith.addf %141, %142 : vector<2x256xf32>
    %cst_83 = arith.constant 0.000000e+00 : f32
    %144 = vector.broadcast %cst_83 : f32 to vector<2x256xf32>
    %145 = arith.maximumf %143, %144 : vector<2x256xf32>
    %146 = arith.truncf %145 : vector<2x256xf32> to vector<2x256xbf16>
    %c0_84 = arith.constant 0 : index
    %c0_85 = arith.constant 0 : index
    %147 = vector.load %arg7[%c0_84, %c0_85] : memref<256x128xbf16, #tpu.memory_space<vmem>>, vector<256x128xbf16>
    %cst_86 = arith.constant dense<0.000000e+00> : vector<2x128xf32>
    %148 = tpu.matmul %146, %147, %cst_86 {dimension_numbers = #tpu.dot_dimension_numbers<[1], [0], [0], [1], [0, 0, 1, 1], [], []>} : vector<2x256xbf16>, vector<256x128xbf16>, vector<2x128xf32> -> vector<2x128xf32>
    %149 = vector.broadcast %5 : vector<1x128xf32> to vector<2x128xf32>
    %150 = arith.addf %148, %149 : vector<2x128xf32>
    %cst_87 = arith.constant 0.000000e+00 : f32
    %151 = vector.broadcast %cst_87 : f32 to vector<2x128xf32>
    %152 = arith.maximumf %150, %151 : vector<2x128xf32>
    %153 = arith.truncf %152 : vector<2x128xf32> to vector<2x128xbf16>
    %c0_88 = arith.constant 0 : index
    %c0_89 = arith.constant 0 : index
    %154 = vector.load %arg8[%c0_88, %c0_89] : memref<128x64xbf16, #tpu.memory_space<vmem>>, vector<128x64xbf16>
    %cst_90 = arith.constant dense<0.000000e+00> : vector<2x64xf32>
    %155 = tpu.matmul %153, %154, %cst_90 {dimension_numbers = #tpu.dot_dimension_numbers<[1], [0], [0], [1], [0, 0, 1, 1], [], []>} : vector<2x128xbf16>, vector<128x64xbf16>, vector<2x64xf32> -> vector<2x64xf32>
    %156 = vector.broadcast %6 : vector<1x64xf32> to vector<2x64xf32>
    %157 = arith.addf %155, %156 : vector<2x64xf32>
    %cst_91 = arith.constant 0.000000e+00 : f32
    %158 = vector.broadcast %cst_91 : f32 to vector<2x64xf32>
    %159 = arith.maximumf %157, %158 : vector<2x64xf32>
    %160 = arith.truncf %159 : vector<2x64xf32> to vector<2x64xbf16>
    %c0_92 = arith.constant 0 : index
    %c0_93 = arith.constant 0 : index
    %161 = vector.load %arg9[%c0_92, %c0_93] : memref<64x32xbf16, #tpu.memory_space<vmem>>, vector<64x32xbf16>
    %cst_94 = arith.constant dense<0.000000e+00> : vector<2x32xf32>
    %162 = tpu.matmul %160, %161, %cst_94 {dimension_numbers = #tpu.dot_dimension_numbers<[1], [0], [0], [1], [0, 0, 1, 1], [], []>} : vector<2x64xbf16>, vector<64x32xbf16>, vector<2x32xf32> -> vector<2x32xf32>
    %163 = vector.broadcast %7 : vector<1x32xf32> to vector<2x32xf32>
    %164 = arith.addf %162, %163 : vector<2x32xf32>
    %cst_95 = arith.constant 0.000000e+00 : f32
    %165 = vector.broadcast %cst_95 : f32 to vector<2x32xf32>
    %166 = arith.maximumf %164, %165 : vector<2x32xf32>
    %167 = arith.truncf %166 : vector<2x32xf32> to vector<2x32xbf16>
    %c0_96 = arith.constant 0 : index
    %c0_97 = arith.constant 0 : index
    %168 = vector.load %arg10[%c0_96, %c0_97] : memref<32x1xbf16, #tpu.memory_space<vmem>>, vector<32x1xbf16>
    %cst_98 = arith.constant dense<0.000000e+00> : vector<2x1xf32>
    %169 = tpu.matmul %167, %168, %cst_98 {dimension_numbers = #tpu.dot_dimension_numbers<[1], [0], [0], [1], [0, 0, 1, 1], [], []>} : vector<2x32xbf16>, vector<32x1xbf16>, vector<2x1xf32> -> vector<2x1xf32>
    %170 = vector.broadcast %8 : vector<1x1xf32> to vector<2x1xf32>
    %171 = arith.addf %169, %170 : vector<2x1xf32>
    %cst_99 = arith.constant 0.000000e+00 : f32
    %172 = vector.broadcast %cst_99 : f32 to vector<2x1xf32>
    %173 = arith.subf %172, %171 : vector<2x1xf32>
    %174 = math.exp %173 : vector<2x1xf32>
    %cst_100 = arith.constant 1.000000e+00 : f32
    %175 = vector.broadcast %cst_100 : f32 to vector<2x1xf32>
    %176 = arith.addf %175, %174 : vector<2x1xf32>
    %177 = tpu.reciprocal %176 {approx = true} : vector<2x1xf32> -> vector<2x1xf32>
    %c0_101 = arith.constant 0 : index
    %c0_102 = arith.constant 0 : index
    %178 = vector.load %arg12[%c0_101, %c0_102] : memref<2x1xf32, #tpu.memory_space<vmem>>, vector<2x1xf32>
    tpu.vector_store %arg12[%c0_101, %c0_102], %177 {strides = array<i32>} : memref<2x1xf32, #tpu.memory_space<vmem>>, vector<2x1xf32>,
    return
  }
}

</mosaic_0001>

<bundles_post_ra>
// kernel: ann_forward.1
= control target key start
LH: loop header
LB: loop body
LE: loop exit
PB: predicated region body
PF: predicated region fallthrough
CT: control target
= control target key end

     0   :  { %vm100_vm0 = vcmask 1045504   ;;  %vm87_vm1 = vcmask 97280   ;;  %v145_v20 = vlaneseq  ;;  %vm3560_vm3 = vcmask 261120   ;;  %s3543_s3 = inlined_call_operand.vmem [shape: bf16[2,12,32], index: 3, kind: input, shape index: {}]   ;;  %s3544_s0 = inlined_call_operand.vmem [shape: bf16[64,12], index: 0, kind: input, shape index: {}]   ;;  %s3545_s4 = inlined_call_operand.vmem [shape: bf16[2,3,32,64], index: 4, kind: input, shape index: {}]   ;;  %s3546_s11 = inlined_call_operand.vmem [shape: f32[9,256], index: 11, kind: input, shape index: {}]   ;;  %s3547_s1 = inlined_call_operand.vmem [shape: bf16[192,12], index: 1, kind: input, shape index: {}]   ;;  %s3548_s5 = inlined_call_operand.vmem [shape: bf16[2,64,256], index: 5, kind: input, shape index: {}]   ;;  %s3549_s6 = inlined_call_operand.vmem [shape: bf16[16,256], index: 6, kind: input, shape index: {}]   ;;  %s3550_s2 = inlined_call_operand.vmem [shape: bf16[2,16], index: 2, kind: input, shape index: {}]   ;;  %s3551_s7 = inlined_call_operand.vmem [shape: bf16[256,128], index: 7, kind: input, shape index: {}]   ;;  %s3552_s8 = inlined_call_operand.vmem [shape: bf16[128,64], index: 8, kind: input, shape index: {}]   ;;  %s3553_s9 = inlined_call_operand.vmem [shape: bf16[64,32], index: 9, kind: input, shape index: {}]   ;;  %s3554_s10 = inlined_call_operand.vmem [shape: bf16[32,1], index: 10, kind: input, shape index: {}]   ;;  %s3555_s12 = inlined_call_operand.vmem [shape: f32[2,1], index: 12, kind: output, shape index: {}]  }
   0x1   :  { %v2044_v0 = vld [vmem:[%s3543_s3] sm:$0xf]  ;;  %v2416_v1 = vld [vmem:[%s3543_s3] sm:$0x30]  ;;  %v2418_v5 = vld [vmem:[%s3544_s0 + $0x8] sm:$0xff]  ;;  %vm3557_vm7 = vcmask 523264  }
   0x2   :  { %v2045_v2 = vor.u32 %v2416_v1, %v2044_v0  ;;  %v2417_v4 = vld [vmem:[%s3544_s0] sm:$0xff]  ;;  %v2419_v6 = vld [vmem:[%s3544_s0 + $0x10] sm:$0xff]  ;;  %v2420_v7 = vld [vmem:[%s3544_s0 + $0x18] sm:$0xff]  ;;  %v2610_v23 = vshrl.u32 %v145_v20, 7  ;;  %vm3556_vm8 = vcmask 1041409  }
   0x3   :  { %v2424_v10 = vld [vmem:[%s3545_s4 + $0x18] sm:$0xff]  ;;  %v2423_v11 = vld [vmem:[%s3545_s4 + $0x10] sm:$0xff]  ;;  %v2426_v13 = vld [vmem:[%s3545_s4 + $0x28] sm:$0xff] }
   0x4   :  { %v102_v3 = vsel %vm100_vm0, %v2045_v2, 0  ;;  %270 = vmatpush.bf16.msra.mxu1 %v2424_v10  ;;  %351 = vmatpush.bf16.msra.mxu3 %v2426_v13  ;;  %v2140_v14 = vld [vmem:[%s3543_s3 + $0x8] sm:$0xf]  ;;  %v2427_v15 = vld [vmem:[%s3543_s3 + $0x8] sm:$0x30]  ;;  %v2425_v16 = vld [vmem:[%s3545_s4 + $0x20] sm:$0xff] }
   0x5   :  { %111 = vmatpush.bf16.msra.mxu0 %v102_v3  ;;  %v2141_v18 = vor.u32 %v2427_v15, %v2140_v14  ;;  %v2422_v21 = vld [vmem:[%s3545_s4 + $0x8] sm:$0xff]  ;;  %v2421_v24 = vld [vmem:[%s3545_s4] sm:$0xff]  ;;  %v2616_v25 = vadd.s32 8, %v2610_v23  ;;  %v2630_v41 = vadd.s32 24, %v2610_v23  ;;  %vm3558_vm4 = vcmp.lt.s32.totalorder %v2610_v23, 7  ;;  %v2431_v10 = vld [vmem:[%s3547_s1 + $0x18] sm:$0xff] }
   0x6   :  { %307 = vmatpush.bf16.msra.mxu2 %v2422_v21  ;;  %v42_v27 = vld [vmem:[%s3546_s11] ss:$0 sm:$0xff]  ;;  %vm218_vm6 = vcmp.lt.s32.totalorder %v2610_v23, 1  ;;  %v2434_v13 = vld [vmem:[%s3547_s1 + $0x30] sm:$0xff] }
   0x7   :  { %v528_v19 = vsel %vm100_vm0, %v2141_v18, 0  ;;  %v161_v29 = vand.u32 15, %v2616_v25  ;;  %v175_v47 = vand.u32 15, %v2630_v41 }
   0x8   :  { %2046 = vmatmul.msk.bf16.vlgmr.msra.gmra.mxu0 %vm87_vm1, %v2417_v4  ;;  %271 = vmatpush.bf16.msra.mxu1 %v2423_v11  ;;  %v2428_v4 = vld [vmem:[%s3547_s1] sm:$0xff] }
   0x9   :  { %352 = vmatpush.bf16.msra.mxu3 %v2425_v16  ;;  %vm2622_vm2 = vcmp.lt.s32.totalorder %v161_v29, 10  ;;  %vm2638_vm5 = vcmp.lt.s32.totalorder %v175_v47, 10  ;;  %v2432_v11 = vld [vmem:[%s3547_s1 + $0x20] sm:$0xff]  ;;  %v2435_v16 = vld [vmem:[%s3547_s1 + $0x38] sm:$0xff]  ;;  %v2437_v47 = vld [vmem:[%s3547_s1 + $0x48] sm:$0xff] }
   0xa   :  { %308 = vmatpush.bf16.msra.mxu2 %v2421_v24 }
   0xc   :  { %537 = vmatpush.bf16.msrb.mxu1 %v528_v19 }
  0x18   :  { %2047 = vmatmul.msk.bf16.gmra.mxu0 %vm87_vm1, %v2418_v5 }
  0x28   :  { %2048 = vmatmul.msk.bf16.gmra.mxu0 %vm87_vm1, %v2419_v6 }
  0x38   :  { %2049 = vmatmul.msk.bf16.gmra.mxu0 %vm87_vm1, %v2420_v7 }
  0x85   :  { %v113_v8 = vpop.f32.mrf.mxu0 }
  0x8d   :  { %v115_v9 = vpop.f32.mrf.mxu0 }
  0x95   :  { %v118_v12 = vpop.f32.mrf.mxu0 }
  0x9d   :  { %v120_v17 = vpop.f32.mrf.mxu0 }
  0xa5   :  { %v123_v22 = vpop.f32.mrf.mxu0 }
  0xa6   :  { %v133_v26 = vmax.f32 %v113_v8, %v123_v22  ;;  %v2429_v8 = vld [vmem:[%s3547_s1 + $0x8] sm:$0xff] }
  0xa8   :  { %v137_v31 = vadd.f32 %v133_v26, %v42_v27  ;;  %v2436_v26 = vld [vmem:[%s3547_s1 + $0x40] sm:$0xff] }
  0xaa   :  { %v141_v35 = vmax.f32 %v137_v31, 0.0 }
  0xac   :  { %v223_v44 = vrot.slane %v141_v35, 1  ;;  %v214_v57 = vrot.slane %v141_v35, 7 }
  0xad   :  { %v125_v28 = vpop.f32.mrf.mxu0 }
  0xae   :  { %v134_v30 = vmax.f32 %v115_v9, %v125_v28  ;;  %v2430_v9 = vld [vmem:[%s3547_s1 + $0x10] sm:$0xff] }
  0xb0   :  { %v138_v32 = vadd.f32 %v134_v30, %v42_v27 }
  0xb2   :  { %v142_v34 = vmax.f32 %v138_v32, 0.0 }
  0xb4   :  { %v211_v36 = vsel %vm2622_vm2, %v142_v34, 0.0 }
  0xb5   :  { %v128_v37 = vpop.f32.mrf.mxu0  ;;  %v238_v38 = vpack.c.bf16 %v211_v36, %v141_v35  ;;  %v224_v42 = vrot.slane %v211_v36, 1  ;;  %v215_v55 = vrot.slane %v211_v36, 7 }
  0xb6   :  { %v135_v39 = vmax.f32 %v118_v12, %v128_v37  ;;  %v2433_v12 = vld [vmem:[%s3547_s1 + $0x28] sm:$0xff] }
  0xb7   :  { %2062 = vmatmul.msk.bf16.vlgmr.msra.gmra.mxu1 %vm3560_vm3, %v238_v38  ;;  %v230_v50 = vsel %vm3558_vm4, %v223_v44, %v224_v42  ;;  %v221_v60 = vsel %vm218_vm6, %v214_v57, %v215_v55 }
  0xb8   :  { %v139_v40 = vadd.f32 %v135_v39, %v42_v27 }
  0xba   :  { %v143_v43 = vmax.f32 %v139_v40, 0.0 }
  0xbc   :  { %v225_v45 = vrot.slane %v143_v43, 1  ;;  %v216_v3 = vrot.slane %v143_v43, 7 }
  0xbd   :  { %v130_v46 = vpop.f32.mrf.mxu0 }
  0xbe   :  { %v136_v48 = vmax.f32 %v120_v17, %v130_v46  ;;  %v229_v49 = vsel %vm3558_vm4, %v224_v42, %v225_v45  ;;  %v220_v6 = vsel %vm218_vm6, %v215_v55, %v216_v3 }
  0xbf   :  { %v320_v51 = vpack.c.bf16 %v229_v49, %v230_v50 }
  0xc0   :  { %v140_v52 = vadd.f32 %v136_v48, %v42_v27  ;;  %v43_v27 = vld [vmem:[%s3546_s11 + $0x1] ss:$0 sm:$0xff] }
  0xc1   :  { %2086 = vmatmul.msk.bf16.vlgmr.msra.gmra.mxu3 %vm3560_vm3, %v320_v51 }
  0xc2   :  { %v144_v54 = vmax.f32 %v140_v52, 0.0 }
  0xc4   :  { %v213_v56 = vsel %vm2638_vm5, %v144_v54, 0.0 }
  0xc5   :  { %v217_v58 = vrot.slane %v213_v56, 7  ;;  %v239_v59 = vpack.c.bf16 %v213_v56, %v143_v43  ;;  %v226_v62 = vrot.slane %v213_v56, 1 }
  0xc7   :  { %2063 = vmatmul.msk.bf16.gmra.mxu1 %vm3560_vm3, %v239_v59  ;;  %v222_v61 = vsel %vm218_vm6, %v217_v58, %v214_v57  ;;  %v228_v0 = vsel %vm3558_vm4, %v225_v45, %v226_v62  ;;  %v231_v1 = vsel %vm3558_vm4, %v226_v62, %v223_v44  ;;  %v219_v5 = vsel %vm218_vm6, %v216_v3, %v217_v58  ;;  %v2438_v3 = vld [vmem:[%s3547_s1 + $0x50] sm:$0xff] }
  0xc8   :  { %v232_v63 = vpack.c.bf16 %v221_v60, %v222_v61  ;;  %v321_v2 = vpack.c.bf16 %v231_v1, %v228_v0  ;;  %v233_v7 = vpack.c.bf16 %v219_v5, %v220_v6 }
  0xca   :  { %2072 = vmatmul.msk.bf16.vlgmr.msra.gmra.mxu2 %vm3560_vm3, %v232_v63 }
  0xd1   :  { %2087 = vmatmul.msk.bf16.gmra.mxu3 %vm3560_vm3, %v321_v2 }
  0xd7   :  { %2142 = vmatmul.msk.bf16.vlgmr.msrb.gmra.mxu1 %vm87_vm1, %v2428_v4 }
  0xda   :  { %2073 = vmatmul.msk.bf16.gmra.mxu2 %vm3560_vm3, %v233_v7 }
  0xe7   :  { %2143 = vmatmul.msk.bf16.gmra.mxu1 %vm87_vm1, %v2429_v8 }
  0xf7   :  { %2144 = vmatmul.msk.bf16.gmra.mxu1 %vm87_vm1, %v2430_v9 }
 0x107   :  { %2145 = vmatmul.msk.bf16.gmra.mxu1 %vm87_vm1, %v2431_v10 }
 0x117   :  { %2146 = vmatmul.msk.bf16.gmra.mxu1 %vm87_vm1, %v2432_v11 }
 0x127   :  { %2147 = vmatmul.msk.bf16.gmra.mxu1 %vm87_vm1, %v2433_v12 }
 0x134   :  { %v273_v14 = vpop.f32.mrf.mxu1 }
 0x137   :  { %2148 = vmatmul.msk.bf16.gmra.mxu1 %vm87_vm1, %v2434_v13 }
 0x13c   :  { %v275_v15 = vpop.f32.mrf.mxu1 }
 0x144   :  { %v278_v17 = vpop.f32.mrf.mxu1  ;;  %v354_v18 = vpop.f32.mrf.mxu3 }
 0x147   :  { %2149 = vmatmul.msk.bf16.gmra.mxu1 %vm87_vm1, %v2435_v16  ;;  %v646_v16 = vand.u32 65535, %v2610_v23 }
 0x14c   :  { %v280_v19 = vpop.f32.mrf.mxu1  ;;  %v356_v24 = vpop.f32.mrf.mxu3 }
 0x14d   :  { %v310_v20 = vpop.f32.mrf.mxu2 }
 0x14e   :  { %v311_v21 = vadd.f32 %v310_v20, %v273_v14  ;;  %v650_v20 = vmul.u32 43690, %v646_v16 }
 0x150   :  { %v364_v22 = vadd.f32 %v354_v18, %v311_v21  ;;  %v2439_v18 = vld [vmem:[%s3547_s1 + $0x58] sm:$0xff] }
 0x152   :  { %v368_v31 = vadd.f32 %v364_v22, %v43_v27  ;;  %v649_v22 = vmul.u32 43691, %v646_v16 }
 0x154   :  { %v2700_v28 = vpop.f32.mrf.mxu1  ;;  %v372_v35 = vmax.f32 %v368_v31, 0.0  ;;  %v359_v38 = vpop.f32.mrf.mxu3  ;;  %v676_v31 = vshrl.u32 %v2616_v25, 16 }
 0x155   :  { %v312_v29 = vpop.f32.mrf.mxu2 }
 0x156   :  { %v313_v30 = vadd.f32 %v312_v29, %v275_v15  ;;  %v381_v43 = vsel %vm3557_vm7, %v372_v35, -inf }
 0x157   :  { %2150 = vmatmul.msk.bf16.gmra.mxu1 %vm87_vm1, %v2436_v26  ;;  %v653_v26 = vshll.u32 %v650_v20, 16 }
 0x158   :  { %v365_v32 = vadd.f32 %v356_v24, %v313_v30 }
 0x159   :  { %vm657_vm9 = vc.u32 %v649_v22, %v653_v26  ;;  %v659_v30 = vadd.s32 %v653_v26, %v649_v22 }
 0x15a   :  { %v369_v34 = vadd.f32 %v365_v32, %v43_v27 }
 0x15c   :  { %v373_v36 = vmax.f32 %v369_v34, 0.0  ;;  %v2703_v37 = vpop.f32.mrf.mxu1  ;;  %v361_v52 = vpop.f32.mrf.mxu3  ;;  %v2499_v34 = vmov 0  }
 0x15d   :  { %v315_v39 = vpop.f32.mrf.mxu2  ;;  %v658_v35 = vsel %vm657_vm9, 1, %v2499_v34 }
 0x15e   :  { %v377_v40 = vsel %vm2622_vm2, %v373_v36, 0.0  ;;  %v316_v42 = vadd.f32 %v315_v39, %v278_v17 }
 0x15f   :  { %v382_v44 = vsel %vm3557_vm7, %v377_v40, -inf }
 0x160   :  { %v383_v45 = vmax.f32 %v381_v43, %v382_v44  ;;  %v366_v46 = vadd.f32 %v359_v38, %v316_v42  ;;  %v680_v42 = vmul.u32 43691, %v676_v31 }
 0x162   :  { %v384_v48 = vrot.slane %v383_v45, 4  ;;  %v370_v54 = vadd.f32 %v366_v46, %v43_v27  ;;  %v684_v46 = vshll.u32 %v680_v42, 16  ;;  %v685_v26 = vshrl.u32 %v680_v42, 16 }
 0x164   :  { %v2712_v49 = vpop.f32.mrf.mxu1  ;;  %v385_v33 = vmax.f32 %v383_v45, %v384_v48  ;;  %v374_v57 = vmax.f32 %v370_v54, 0.0  ;;  %v2747_v45 = vadd.s32 16, %v2610_v23  ;;  %v654_v48 = vshrl.u32 %v650_v20, 16 }
 0x165   :  { %v317_v50 = vpop.f32.mrf.mxu2 }
 0x166   :  { %v318_v51 = vadd.f32 %v317_v50, %v280_v19  ;;  %v386_v58 = vrot.slane %v385_v33, 2  ;;  %v390_v62 = vsel %vm3557_vm7, %v374_v57, -inf  ;;  %v647_v19 = vshrl.u32 %v2610_v23, 16 }
 0x167   :  { %2151 = vmatmul.msk.bf16.gmra.mxu1 %vm87_vm1, %v2437_v47 }
 0x168   :  { %v367_v55 = vadd.f32 %v361_v52, %v318_v51  ;;  %v387_v0 = vmax.f32 %v385_v33, %v386_v58  ;;  %v651_v24 = vmul.u32 43691, %v647_v19  ;;  %v652_v32 = vmul.u32 43690, %v647_v19 }
 0x169   :  { %v704_v51 = vand.u32 65535, %v2747_v45  ;;  %v681_v52 = vmul.u32 43690, %v676_v31  ;;  %v705_v33 = vshrl.u32 %v2747_v45, 16 }
 0x16a   :  { %v371_v56 = vadd.f32 %v367_v55, %v43_v27  ;;  %v388_v4 = vrot.slane %v387_v0, 1  ;;  %v675_v27 = vand.u32 65535, %v2616_v25  ;;  %v655_v29 = vshll.u32 %v651_v24, 16 }
 0x16b   :  { %v660_v40 = vadd.s32 %v658_v35, %v652_v32  ;;  %v708_v55 = vmul.u32 43690, %v704_v51  ;;  %v656_v57 = vshrl.u32 %v651_v24, 16  ;;  %v2765_v32 = vadd.s32 32, %v2610_v23 }
 0x16c   :  { %v375_v59 = vmax.f32 %v371_v56, 0.0  ;;  %v2715_v60 = vpop.f32.mrf.mxu1  ;;  %v389_v53 = vmax.f32 %v387_v0, %v388_v4  ;;  %vm661_vm10 = vc.u32 %v659_v30, %v655_v29  ;;  %v679_v36 = vmul.u32 43690, %v675_v27 }
 0x16d   :  { %v678_v38 = vmul.u32 43691, %v675_v27  ;;  %v662_v44 = vsel %vm661_vm10, 1, %v2499_v34  ;;  %v734_v4 = vshrl.u32 %v2630_v41, 16  ;;  %v712_v19 = vshrl.u32 %v708_v55, 16 }
 0x16e   :  { %v379_v61 = vsel %vm2638_vm5, %v375_v59, 0.0  ;;  %v1469_v10 = vpack.c.bf16 %v389_v53, %v389_v53  ;;  %v682_v43 = vshll.u32 %v679_v36, 16  ;;  %v664_v50 = vadd.s32 %v662_v44, %v660_v40 }
 0x16f   :  { %v391_v63 = vsel %vm3557_vm7, %v379_v61, -inf  ;;  %v707_v59 = vmul.u32 43691, %v704_v51  ;;  %v709_v61 = vmul.u32 43691, %v705_v33  ;;  %v738_v22 = vmul.u32 43691, %v734_v4 }
 0x170   :  { %v392_v1 = vmax.f32 %v390_v62, %v391_v63  ;;  %v1568_v14 = vunpack.c.l.b16 %v1469_v10  ;;  %vm686_vm11 = vc.u32 %v678_v38, %v682_v43  ;;  %v688_v47 = vadd.s32 %v682_v43, %v678_v38 }
 0x171   :  { %v687_v54 = vsel %vm686_vm11, 1, %v2499_v34  ;;  %v665_v58 = vadd.s32 %v664_v50, %v654_v48  ;;  %v711_v63 = vshll.u32 %v708_v55, 16  ;;  %v739_v24 = vmul.u32 43690, %v734_v4 }
 0x172   :  { %v393_v2 = vrot.slane %v392_v1, 4  ;;  %vm690_vm12 = vc.u32 %v688_v47, %v684_v46  ;;  %v689_v62 = vadd.s32 %v687_v54, %v681_v52  ;;  %v742_v30 = vshll.u32 %v738_v22, 16 }
 0x173   :  { %v691_v0 = vsel %vm690_vm12, 1, %v2499_v34  ;;  %vm715_vm13 = vc.u32 %v707_v59, %v711_v63  ;;  %v717_v53 = vadd.s32 %v711_v63, %v707_v59  ;;  %v714_v38 = vshrl.u32 %v709_v61, 16 }
 0x174   :  { %v394_v5 = vmax.f32 %v392_v1, %v393_v2  ;;  %v2724_v6 = vpop.f32.mrf.mxu1  ;;  %v710_v1 = vmul.u32 43690, %v705_v33  ;;  %v713_v2 = vshll.u32 %v709_v61, 16  ;;  %v762_v46 = vand.u32 65535, %v2765_v32 }
 0x175   :  { %v763_v50 = vshrl.u32 %v2765_v32, 16  ;;  %v743_v61 = vshrl.u32 %v738_v22, 16 }
 0x176   :  { %v395_v7 = vrot.slane %v394_v5, 2  ;;  %vm719_vm14 = vc.u32 %v717_v53, %v713_v2  ;;  %v766_v54 = vmul.u32 43690, %v762_v46  ;;  %v765_v55 = vmul.u32 43691, %v762_v46 }
 0x177   :  { %2152 = vmatmul.msk.bf16.gmra.mxu1 %vm87_vm1, %v2438_v3  ;;  %v733_v3 = vand.u32 65535, %v2630_v41  ;;  %v2780_v2 = vadd.s32 40, %v2610_v23 }
 0x178   :  { %v396_v8 = vmax.f32 %v394_v5, %v395_v7  ;;  %v666_v5 = vadd.s32 %v665_v58, %v656_v57  ;;  %v716_v7 = vsel %vm715_vm13, 1, %v2499_v34  ;;  %v767_v57 = vmul.u32 43691, %v763_v50 }
 0x179   :  { %v718_v10 = vadd.s32 %v716_v7, %v710_v1 }
 0x17a   :  { %v397_v9 = vrot.slane %v396_v8, 1  ;;  %v667_v16 = vshrl.u32 %v666_v5, 5  ;;  %v771_v1 = vshll.u32 %v767_v57, 16 }
 0x17c   :  { %v398_v11 = vmax.f32 %v396_v8, %v397_v9  ;;  %v2727_v12 = vpop.f32.mrf.mxu1  ;;  %v683_v8 = vshrl.u32 %v679_v36, 16  ;;  %v693_v9 = vadd.s32 %v691_v0, %v689_v62  ;;  %v668_v35 = vmul.u32 48, %v667_v16  ;;  %v2442_v36 = vld [vmem:[%s3545_s4 + $0x40] sm:$0xff]  ;;  %v2444_v16 = vld [vmem:[%s3545_s4 + $0x50] sm:$0xff] }
 0x17d   :  { %v769_v62 = vshll.u32 %v766_v54, 16  ;;  %v768_v0 = vmul.u32 43690, %v763_v50 }
 0x17e   :  { %v1470_v13 = vpack.c.bf16 %v398_v11, %v398_v11  ;;  %v736_v11 = vmul.u32 43691, %v733_v3  ;;  %v694_v27 = vadd.s32 %v693_v9, %v683_v8  ;;  %v2777_v58 = vsub.s32 %v2610_v23, %v668_v35 }
 0x17f   :  { %v775_v4 = vadd.s32 %v769_v62, %v765_v55  ;;  %v791_v9 = vand.u32 65535, %v2780_v2 }
 0x180   :  { %v1569_v15 = vunpack.c.l.b16 %v1470_v13  ;;  %v695_v44 = vadd.s32 %v694_v27, %v685_v26  ;;  %vm991_vm5 = vcmp.ne.s32.totalorder %v2777_v58, 0  ;;  %vm1003_vm9 = vcmp.lt.s32.totalorder %v2777_v58, 0 }
 0x181   :  { %vm777_vm2 = vc.u32 %v775_v4, %v771_v1  ;;  %v1027_v27 = vadd.s32 48, %v2777_v58  ;;  %vm2802_vm10 = vmand %vm1003_vm9, %vm991_vm5 }
 0x182   :  { %v2731_v17 = vsel %vm3556_vm8, %v1569_v15, %v1568_v14  ;;  %v720_v14 = vsel %vm719_vm14, 1, %v2499_v34  ;;  %v737_v15 = vmul.u32 43690, %v733_v3  ;;  %v696_v59 = vshrl.u32 %v695_v44, 5  ;;  %v2445_v3 = vld [vmem:[%s3545_s4 + $0x58] sm:$0xff] }
 0x183   :  { %v722_v20 = vadd.s32 %v720_v14, %v718_v10  ;;  %1354 = vmatpush.bf16.msrb.mxu0 %v2445_v3  ;;  %v792_v14 = vshrl.u32 %v2780_v2, 16 }
 0x184   :  { %v2737_v21 = vpop.f32.mrf.mxu1  ;;  %v740_v29 = vshll.u32 %v737_v15, 16  ;;  %v741_v47 = vshrl.u32 %v737_v15, 16  ;;  %v697_v53 = vmul.u32 48, %v696_v59 }
 0x185   :  { %v723_v40 = vadd.s32 %v722_v20, %v712_v19  ;;  %v795_v20 = vmul.u32 43690, %v791_v9  ;;  %v796_v26 = vmul.u32 43691, %v792_v14 }
 0x186   :  { %vm744_vm15 = vc.u32 %v736_v11, %v740_v29  ;;  %v746_v31 = vadd.s32 %v740_v29, %v736_v11  ;;  %v778_v11 = vsel %vm777_vm2, 1, %v2499_v34  ;;  %v2798_v29 = vsub.s32 %v2616_v25, %v697_v53 }
 0x187   :  { %2153 = vmatmul.msk.bf16.gmra.mxu1 %vm87_vm1, %v2439_v18  ;;  %v2443_v18 = vld [vmem:[%s3545_s4 + $0x48] sm:$0xff]  ;;  %v745_v43 = vsel %vm744_vm15, 1, %v2499_v34  ;;  %v724_v33 = vadd.s32 %v723_v40, %v714_v38  ;;  %vm773_vm1 = vc.u32 %v765_v55, %v769_v62  ;;  %1355 = vmatpush.bf16.msrb.mxu0 %v2444_v16  ;;  %v800_v38 = vshll.u32 %v796_v26, 16 }
 0x188   :  { %1205 = vmatpush.bf16.msrb.mxu2 %v2443_v18  ;;  %v747_v42 = vadd.s32 %v745_v43, %v739_v24  ;;  %vm748_vm0 = vc.u32 %v746_v31, %v742_v30  ;;  %v774_v7 = vsel %vm773_vm1, 1, %v2499_v34  ;;  %v770_v18 = vshrl.u32 %v766_v54, 16 }
 0x189   :  { %v749_v48 = vsel %vm748_vm0, 1, %v2499_v34  ;;  %v725_v5 = vshrl.u32 %v724_v33, 5  ;;  %v776_v8 = vadd.s32 %v774_v7, %v768_v0  ;;  %v794_v24 = vmul.u32 43691, %v791_v9 }
 0x18a   :  { %v751_v52 = vadd.s32 %v749_v48, %v747_v42  ;;  %v798_v30 = vshll.u32 %v795_v20, 16  ;;  %v2807_v40 = vadd.s32 48, %v2610_v23  ;;  %v772_v43 = vshrl.u32 %v767_v57, 16 }
 0x18b   :  { %v780_v19 = vadd.s32 %v778_v11, %v776_v8  ;;  %v726_v22 = vmul.u32 48, %v725_v5  ;;  %vm992_vm12 = vcmp.ne.s32.totalorder %v2798_v29, 0  ;;  %vm1004_vm13 = vcmp.lt.s32.totalorder %v2798_v29, 0  ;;  %v2837_v8 = vld [vmem:[%s3546_s11 + $0x2] ss:$0 sm:$0xff] }
 0x18c   :  { %v2743_v39 = vpop.f32.mrf.mxu1  ;;  %1206 = vmatpush.bf16.msrb.mxu2 %v2442_v36  ;;  %v752_v63 = vadd.s32 %v751_v52, %v741_v47  ;;  %v797_v36 = vmul.u32 43690, %v792_v14  ;;  %vm802_vm11 = vc.u32 %v794_v24, %v798_v30  ;;  %v804_v25 = vadd.s32 %v798_v30, %v794_v24  ;;  %vm2827_vm1 = vmand %vm1004_vm13, %vm992_vm12 }
 0x18d   :  { %v781_v44 = vadd.s32 %v780_v19, %v770_v18  ;;  %v727_v42 = vsub.s32 %v2747_v45, %v726_v22  ;;  %v820_v46 = vand.u32 65535, %v2807_v40  ;;  %v1039_v47 = vsel %vm2802_vm10, %v1027_v27, %v2777_v58  ;;  %v2460_v18 = vld [vmem:[%s3548_s5 + $0x74] sm:$0xf] }
 0x18e   :  { %v753_v10 = vadd.s32 %v752_v63, %v743_v61  ;;  %v803_v48 = vsel %vm802_vm11, 1, %v2499_v34  ;;  %v799_v52 = vshrl.u32 %v795_v20, 16  ;;  %vm806_vm14 = vc.u32 %v804_v25, %v800_v38 }
 0x18f   :  { %v805_v54 = vadd.s32 %v803_v48, %v797_v36  ;;  %v782_v45 = vadd.s32 %v781_v44, %v772_v43  ;;  %v807_v55 = vsel %vm806_vm14, 1, %v2499_v34  ;;  %v821_v57 = vshrl.u32 %v2807_v40, 16 }
 0x190   :  { %v754_v35 = vshrl.u32 %v753_v10, 5  ;;  %v824_v59 = vmul.u32 43690, %v820_v46  ;;  %vm993_vm15 = vcmp.ne.s32.totalorder %v727_v42, 0  ;;  %vm1005_vm0 = vcmp.lt.s32.totalorder %v727_v42, 0 }
 0x191   :  { %v809_v58 = vadd.s32 %v807_v55, %v805_v54  ;;  %v823_v61 = vmul.u32 43691, %v820_v46  ;;  %v1028_v62 = vadd.s32 48, %v2798_v29  ;;  %v1029_v63 = vadd.s32 48, %v727_v42  ;;  %vm2839_vm2 = vmand %vm1005_vm0, %vm993_vm15 }
 0x192   :  { %v755_v50 = vmul.u32 48, %v754_v35  ;;  %v2820_v0 = vmul.u32 43691, %v821_v57  ;;  %v827_v1 = vshll.u32 %v824_v59, 16  ;;  %v801_v5 = vshrl.u32 %v796_v26, 16 }
 0x193   :  { %v810_v7 = vadd.s32 %v809_v58, %v799_v52  ;;  %v2832_v53 = vadd.s32 56, %v2610_v23  ;;  %v783_v10 = vshrl.u32 %v782_v45, 5  ;;  %v826_v11 = vmul.u32 43690, %v821_v57 }
 0x194   :  { %v2752_v56 = vpop.f32.mrf.mxu1  ;;  %v2844_v9 = vsub.s32 %v2630_v41, %v755_v50  ;;  %v829_v14 = vshll.u32 %v2820_v0, 16  ;;  %vm831_vm5 = vc.u32 %v823_v61, %v827_v1  ;;  %v833_v16 = vadd.s32 %v827_v1, %v823_v61 }
 0x195   :  { %vm2847_vm9 = vcmp.lt.s32.totalorder %v1039_v47, 40  ;;  %v832_v19 = vsel %vm831_vm5, 1, %v2499_v34  ;;  %v849_v20 = vand.u32 65535, %v2832_v53  ;;  %v1040_v41 = vsel %vm2827_vm1, %v1028_v62, %v2798_v29 }
 0x196   :  { %v1041_v24 = vsel %vm2839_vm2, %v1029_v63, %v727_v42  ;;  %v811_v26 = vadd.s32 %v810_v7, %v801_v5  ;;  %vm994_vm10 = vcmp.ne.s32.totalorder %v2844_v9, 0  ;;  %v784_v30 = vmul.u32 48, %v783_v10 }
 0x197   :  { %v834_v31 = vadd.s32 %v832_v19, %v826_v11  ;;  %vm835_vm11 = vc.u32 %v833_v16, %v829_v14  ;;  %vm1006_vm12 = vcmp.lt.s32.totalorder %v2844_v9, 0  ;;  %v828_v36 = vshrl.u32 %v824_v59, 16 }
 0x198   :  { %v836_v38 = vsel %vm835_vm11, 1, %v2499_v34  ;;  %v850_v29 = vshrl.u32 %v2832_v53, 16  ;;  %v852_v44 = vmul.u32 43691, %v849_v20  ;;  %v853_v25 = vmul.u32 43690, %v849_v20  ;;  %vm2883_vm15 = vmand %vm1006_vm12, %vm994_vm10 }
 0x199   :  { %v838_v43 = vadd.s32 %v836_v38, %v834_v31  ;;  %vm2865_vm13 = vcmp.lt.s32.totalorder %v1040_v41, 40  ;;  %v812_v48 = vshrl.u32 %v811_v26, 5  ;;  %vm2869_vm14 = vcmp.lt.s32.totalorder %v1041_v24, 40 }
 0x19a   :  { %v1030_v50 = vadd.s32 48, %v2844_v9  ;;  %v2875_v52 = vsub.s32 %v2765_v32, %v784_v30  ;;  %v2877_v54 = vmul.u32 43691, %v850_v29  ;;  %v830_v57 = vshrl.u32 %v2820_v0, 16 }
 0x19b   :  { %v839_v59 = vadd.s32 %v838_v43, %v828_v36  ;;  %v855_v58 = vmul.u32 43690, %v850_v29  ;;  %v2890_v62 = vadd.s32 64, %v2610_v23  ;;  %v857_v26 = vshrl.u32 %v853_v25, 16 }
 0x19c   :  { %v2758_v13 = vpop.f32.mrf.mxu1  ;;  %v858_v61 = vshll.u32 %v2877_v54, 16  ;;  %v1042_v7 = vsel %vm2883_vm15, %v1030_v50, %v2844_v9  ;;  %vm995_vm1 = vcmp.ne.s32.totalorder %v2875_v52, 0  ;;  %vm1007_vm2 = vcmp.lt.s32.totalorder %v2875_v52, 0 }
 0x19d   :  { %v2910_v10 = vadd.s32 48, %v2875_v52  ;;  %v840_v11 = vadd.s32 %v839_v59, %v830_v57  ;;  %v878_v19 = vand.u32 65535, %v2890_v62  ;;  %v879_v9 = vshrl.u32 %v2890_v62, 16  ;;  %vm2957_vm15 = vmand %vm1007_vm2, %vm995_vm1 }
 0x19e   :  { %vm2922_vm10 = vcmp.lt.s32.totalorder %v1042_v7, 40  ;;  %v2929_v31 = vadd.s32 72, %v2610_v23 }
 0x19f   :  { %v2926_v30 = vmul.u32 43690, %v878_v19  ;;  %v881_v38 = vmul.u32 43691, %v878_v19  ;;  %v2932_v43 = vmul.u32 43691, %v879_v9  ;;  %v841_v29 = vshrl.u32 %v840_v11, 5 }
 0x1a0   :  { %v907_v55 = vand.u32 65535, %v2929_v31  ;;  %v1043_v7 = vsel %vm2957_vm15, %v2910_v10, %v2875_v52  ;;  %v908_v11 = vshrl.u32 %v2929_v31, 16 }
 0x1a4   :  { %v2774_v51 = vpop.f32.mrf.mxu1 }
 0x1ac   :  { %v2790_v15 = vpop.f32.mrf.mxu1 }
 0x1b4   :  { %v569_v33 = vpop.f32.mrf.mxu1 }
 0x1b5   :  { %v599_v3 = vmax.f32 %v2700_v28, %v569_v33  ;;  %v856_v33 = vshll.u32 %v853_v25, 16 }
 0x1b7   :  { %v611_v22 = vadd.f32 %v599_v3, %v2837_v8  ;;  %vm860_vm0 = vc.u32 %v852_v44, %v856_v33  ;;  %v862_v32 = vadd.s32 %v856_v33, %v852_v44  ;;  %v813_v3 = vmul.u32 48, %v812_v48 }
 0x1b8   :  { %v861_v0 = vsel %vm860_vm0, 1, %v2499_v34  ;;  %v885_v44 = vshll.u32 %v2926_v30, 16  ;;  %v859_v33 = vshrl.u32 %v2877_v54, 16 }
 0x1b9   :  { %v623_v42 = vmax.f32 %v611_v22, 0.0  ;;  %v863_v14 = vadd.s32 %v861_v0, %v855_v58  ;;  %vm864_vm5 = vc.u32 %v862_v32, %v858_v61  ;;  %v887_v61 = vshll.u32 %v2932_v43, 16 }
 0x1ba   :  { %v865_v41 = vsel %vm864_vm5, 1, %v2499_v34  ;;  %vm889_vm0 = vc.u32 %v881_v38, %v885_v44  ;;  %v842_v32 = vmul.u32 48, %v841_v29  ;;  %vm3011_vm5 = vcmp.lt.s32.totalorder %v1043_v7, 40 }
 0x1bb   :  { %v2894_v63 = vsel %vm2847_vm9, %v623_v42, 0.0  ;;  %v888_v58 = vshrl.u32 %v2932_v43, 16 }
 0x1bc   :  { %v571_v27 = vpop.f32.mrf.mxu1  ;;  %v1099_v20 = vrot.slane %v2894_v63, 7  ;;  %v2994_v10 = vsub.s32 %v2807_v40, %v842_v32  ;;  %v913_v40 = vmul.u32 43690, %v908_v11 }
 0x1bd   :  { %v600_v35 = vmax.f32 %v2703_v37, %v571_v27  ;;  %v867_v27 = vadd.s32 %v865_v41, %v863_v14  ;;  %v2978_v14 = vmul.u32 43690, %v907_v55  ;;  %v2244_v37 = vld [vmem:[%s3548_s5 + $0x78] sm:$0xf0] }
 0x1bf   :  { %v612_v46 = vadd.f32 %v600_v35, %v2837_v8  ;;  %v1123_v35 = vrot.slane %v2894_v63, 1 }
 0x1c1   :  { %v624_v45 = vmax.f32 %v612_v46, 0.0  ;;  %v884_v46 = vmul.u32 43690, %v879_v9 }
 0x1c3   :  { %v2898_v1 = vsel %vm2865_vm13, %v624_v45, 0.0  ;;  %v868_v45 = vadd.s32 %v867_v27, %v857_v26  ;;  %v910_v26 = vmul.u32 43691, %v907_v55  ;;  %v2997_v27 = vmul.u32 43691, %v908_v11 }
 0x1c4   :  { %v1158_v4 = vpack.c.bf16 %v2898_v1, %v2894_v63  ;;  %v574_v5 = vpop.f32.mrf.mxu1  ;;  %v1100_v16 = vrot.slane %v2898_v1, 7 }
 0x1c5   :  { %v601_v28 = vmax.f32 %v2712_v49, %v574_v5  ;;  %v2919_v49 = vsub.s32 %v2780_v2, %v813_v3  ;;  %v1124_v2 = vrot.slane %v2898_v1, 1  ;;  %v890_v1 = vsel %vm889_vm0, 1, %v2499_v34 }
 0x1c6   :  { %2170 = vmatmul.msk.bf16.vlgmr.msrb.gmra.mxu2 %vm3560_vm3, %v1158_v4  ;;  %v2940_v25 = vsel %vm218_vm6, %v1099_v20, %v1100_v16  ;;  %v891_v4 = vadd.s32 %v885_v44, %v881_v38  ;;  %v892_v5 = vadd.s32 %v890_v1, %v884_v46  ;;  %v869_v9 = vadd.s32 %v868_v45, %v859_v33 }
 0x1c7   :  { %v613_v22 = vadd.f32 %v601_v28, %v2837_v8  ;;  %vm996_vm11 = vcmp.ne.s32.totalorder %v2919_v49, 0  ;;  %vm1008_vm12 = vcmp.lt.s32.totalorder %v2919_v49, 0  ;;  %v1032_v28 = vadd.s32 48, %v2919_v49 }
 0x1c8   :  { %vm893_vm1 = vc.u32 %v891_v4, %v887_v61  ;;  %vm2989_vm2 = vmand %vm1008_vm12, %vm996_vm11  ;;  %v3008_v46 = vadd.s32 80, %v2610_v23  ;;  %v870_v45 = vshrl.u32 %v869_v9, 5  ;;  %vm997_vm11 = vcmp.ne.s32.totalorder %v2994_v10, 0 }
 0x1c9   :  { %v625_v36 = vmax.f32 %v613_v22, 0.0  ;;  %v894_v41 = vsel %vm893_vm1, 1, %v2499_v34  ;;  %vm1009_vm0 = vcmp.lt.s32.totalorder %v2994_v10, 0 }
 0x1ca   :  { %v896_v38 = vadd.s32 %v894_v41, %v892_v5  ;;  %v936_v1 = vand.u32 65535, %v3008_v46  ;;  %v871_v4 = vmul.u32 48, %v870_v45  ;;  %v937_v5 = vshrl.u32 %v3008_v46, 16 }
 0x1cb   :  { %v2944_v42 = vsel %vm2869_vm14, %v625_v36, 0.0  ;;  %v886_v36 = vshrl.u32 %v2926_v30, 16  ;;  %v1044_v30 = vsel %vm2989_vm2, %v1032_v28, %v2919_v49  ;;  %vm3054_vm2 = vmand %vm1009_vm0, %vm997_vm11 }
 0x1cc   :  { %v1125_v48 = vrot.slane %v2944_v42, 1  ;;  %v576_v50 = vpop.f32.mrf.mxu1  ;;  %v1101_v57 = vrot.slane %v2944_v42, 7  ;;  %vm3025_vm15 = vcmp.lt.s32.totalorder %v1044_v30, 40  ;;  %v3034_v7 = vmul.u32 43690, %v936_v1 }
 0x1cd   :  { %v602_v59 = vmax.f32 %v2715_v60, %v576_v50  ;;  %v1145_v60 = vsel %vm3558_vm4, %v1123_v35, %v1124_v2  ;;  %v897_v61 = vadd.s32 %v896_v38, %v886_v36  ;;  %v3047_v52 = vmul.u32 43691, %v937_v5 }
 0x1ce   :  { %v1144_v54 = vsel %vm3558_vm4, %v1124_v2, %v1125_v48  ;;  %v2983_v22 = vsel %vm218_vm6, %v1100_v16, %v1101_v57  ;;  %v914_v2 = vshll.u32 %v2978_v14, 16  ;;  %v915_v38 = vshrl.u32 %v2978_v14, 16 }
 0x1cf   :  { %v614_v3 = vadd.f32 %v602_v59, %v2837_v8  ;;  %v1307_v0 = vpack.c.bf16 %v1144_v54, %v1145_v60  ;;  %v916_v59 = vshll.u32 %v2997_v27, 16  ;;  %v3068_v30 = vadd.s32 88, %v2610_v23 }
 0x1d0   :  { %vm918_vm12 = vc.u32 %v910_v26, %v914_v2  ;;  %v920_v49 = vadd.s32 %v914_v2, %v910_v26 }
 0x1d1   :  { %v626_v19 = vmax.f32 %v614_v3, 0.0  ;;  %2202 = vmatmul.msk.bf16.vlgmr.msrb.gmra.mxu0 %vm3560_vm3, %v1307_v0  ;;  %v919_v54 = vsel %vm918_vm12, 1, %v2499_v34  ;;  %v1033_v0 = vadd.s32 48, %v2994_v10 }
 0x1d2   :  { %v921_v32 = vadd.s32 %v919_v54, %v913_v40  ;;  %vm922_vm1 = vc.u32 %v920_v49, %v916_v59  ;;  %v3064_v40 = vsub.s32 %v2832_v53, %v871_v4  ;;  %v945_v53 = vshll.u32 %v3047_v52, 16 }
 0x1d3   :  { %v3001_v16 = vsel %vm2922_vm10, %v626_v19, 0.0  ;;  %v898_v19 = vadd.s32 %v897_v61, %v888_v58  ;;  %v923_v9 = vsel %vm922_vm1, 1, %v2499_v34  ;;  %v1045_v58 = vsel %vm3054_vm2, %v1033_v0, %v2994_v10 }
 0x1d4   :  { %v579_v29 = vpop.f32.mrf.mxu1  ;;  %v1159_v44 = vpack.c.bf16 %v3001_v16, %v2944_v42  ;;  %v1102_v55 = vrot.slane %v3001_v16, 7  ;;  %v1126_v43 = vrot.slane %v3001_v16, 1  ;;  %v925_v2 = vadd.s32 %v923_v9, %v921_v32 }
 0x1d5   :  { %v603_v50 = vmax.f32 %v2724_v6, %v579_v29  ;;  %v939_v29 = vmul.u32 43691, %v936_v1  ;;  %v899_v61 = vshrl.u32 %v898_v19, 5  ;;  %v917_v54 = vshrl.u32 %v2997_v27, 16 }
 0x1d6   :  { %2171 = vmatmul.msk.bf16.gmra.mxu2 %vm3560_vm3, %v1159_v44  ;;  %v3040_v28 = vsel %vm218_vm6, %v1101_v57, %v1102_v55  ;;  %v2441_v57 = vld [vmem:[%s3545_s4 + $0x38] sm:$0xff]  ;;  %v1143_v14 = vsel %vm3558_vm4, %v1125_v48, %v1126_v43  ;;  %v926_v49 = vadd.s32 %v925_v2, %v915_v38  ;;  %v965_v1 = vand.u32 65535, %v3068_v30 }
 0x1d7   :  { %v615_v6 = vadd.f32 %v603_v50, %v2837_v8  ;;  %v943_v50 = vshll.u32 %v3034_v7, 16  ;;  %1274 = vmatpush.bf16.msrb.mxu3 %v2441_v57  ;;  %vm998_vm12 = vcmp.ne.s32.totalorder %v3064_v40, 0  ;;  %vm1010_vm0 = vcmp.lt.s32.totalorder %v3064_v40, 0 }
 0x1d8   :  { %v900_v0 = vmul.u32 48, %v899_v61  ;;  %vm3093_vm2 = vcmp.lt.s32.totalorder %v1045_v58, 40  ;;  %v1034_v9 = vadd.s32 48, %v3064_v40  ;;  %v968_v38 = vmul.u32 43691, %v965_v1 }
 0x1d9   :  { %v627_v3 = vmax.f32 %v615_v6, 0.0  ;;  %vm947_vm11 = vc.u32 %v939_v29, %v943_v50  ;;  %v949_v42 = vadd.s32 %v943_v50, %v939_v29  ;;  %v969_v2 = vmul.u32 43690, %v965_v1 }
 0x1da   :  { %v948_v48 = vsel %vm947_vm11, 1, %v2499_v34  ;;  %vm3100_vm11 = vmand %vm1010_vm0, %vm998_vm12  ;;  %v944_v50 = vshrl.u32 %v3034_v7, 16  ;;  %v946_v61 = vshrl.u32 %v3047_v52, 16 }
 0x1db   :  { %v3044_v11 = vsel %vm3011_vm5, %v627_v3, 0.0  ;;  %v966_v3 = vshrl.u32 %v3068_v30, 16  ;;  %vm951_vm1 = vc.u32 %v949_v42, %v945_v53  ;;  %v1046_v58 = vsel %vm3100_vm11, %v1034_v9, %v3064_v40 }
 0x1dc   :  { %v1127_v41 = vrot.slane %v3044_v11, 1  ;;  %v581_v26 = vpop.f32.mrf.mxu1  ;;  %v952_v4 = vsel %vm951_vm1, 1, %v2499_v34 }
 0x1dd   :  { %v604_v44 = vmax.f32 %v2727_v12, %v581_v26  ;;  %v942_v12 = vmul.u32 43690, %v937_v5  ;;  %v927_v26 = vadd.s32 %v926_v49, %v917_v54  ;;  %v3104_v29 = vmul.u32 43691, %v966_v3 }
 0x1de   :  { %v1142_v45 = vsel %vm3558_vm4, %v1126_v43, %v1127_v41  ;;  %v971_v53 = vmul.u32 43690, %v966_v3 }
 0x1df   :  { %v616_v59 = vadd.f32 %v604_v44, %v2837_v8  ;;  %v1308_v6 = vpack.c.bf16 %v1142_v45, %v1143_v14  ;;  %v950_v10 = vadd.s32 %v948_v48, %v942_v12  ;;  %v1148_v14 = vpack.c.bf16 %v3040_v28, %v2983_v22 }
 0x1e0   :  { %v974_v7 = vshll.u32 %v3104_v29, 16  ;;  %v928_v42 = vshrl.u32 %v927_v26, 5 }
 0x1e1   :  { %v628_v32 = vmax.f32 %v616_v59, 0.0  ;;  %2203 = vmatmul.msk.bf16.gmra.mxu0 %vm3560_vm3, %v1308_v6  ;;  %v954_v45 = vadd.s32 %v952_v4, %v950_v10  ;;  %v972_v59 = vshll.u32 %v969_v2, 16  ;;  %v1103_v6 = vrot.slane %v3044_v11, 7 }
 0x1e3   :  { %v1092_v27 = vsel %vm3025_vm15, %v628_v32, 0.0  ;;  %vm976_vm12 = vc.u32 %v968_v38, %v972_v59  ;;  %v955_v32 = vadd.s32 %v954_v45, %v944_v50  ;;  %v3132_v4 = vsel %vm218_vm6, %v1102_v55, %v1103_v6 }
 0x1e4   :  { %v584_v5 = vpop.f32.mrf.mxu1  ;;  %v1160_v19 = vpack.c.bf16 %v1092_v27, %v3044_v11  ;;  %v1104_v44 = vrot.slane %v1092_v27, 7  ;;  %v1128_v54 = vrot.slane %v1092_v27, 1  ;;  %v977_v48 = vsel %vm976_vm12, 1, %v2499_v34 }
 0x1e5   :  { %v605_v36 = vmax.f32 %v2737_v21, %v584_v5  ;;  %v901_v21 = vsub.s32 %v2890_v62, %v900_v0  ;;  %v978_v62 = vadd.s32 %v972_v59, %v968_v38  ;;  %v979_v52 = vadd.s32 %v977_v48, %v971_v53  ;;  %v2440_v0 = vld [vmem:[%s3545_s4 + $0x30] sm:$0xff] }
 0x1e6   :  { %2172 = vmatmul.msk.bf16.gmra.mxu2 %vm3560_vm3, %v1160_v19  ;;  %v3121_v1 = vsel %vm218_vm6, %v1103_v6, %v1104_v44  ;;  %v929_v19 = vmul.u32 48, %v928_v42  ;;  %v1141_v16 = vsel %vm3558_vm4, %v1127_v41, %v1128_v54  ;;  %v956_v57 = vadd.s32 %v955_v32, %v946_v61  ;;  %1275 = vmatpush.bf16.msrb.mxu3 %v2440_v0 }
 0x1e7   :  { %v617_v12 = vadd.f32 %v605_v36, %v2837_v8  ;;  %vm999_vm0 = vcmp.ne.s32.totalorder %v901_v21, 0  ;;  %vm1011_vm1 = vcmp.lt.s32.totalorder %v901_v21, 0  ;;  %vm980_vm11 = vc.u32 %v978_v62, %v974_v7 }
 0x1e8   :  { %v981_v9 = vsel %vm980_vm11, 1, %v2499_v34  ;;  %v1149_v26 = vpack.c.bf16 %v3121_v1, %v3132_v4  ;;  %v973_v38 = vshrl.u32 %v969_v2, 16  ;;  %vm3149_vm12 = vcmp.lt.s32.totalorder %v1046_v58, 40  ;;  %vm3156_vm11 = vmand %vm1011_vm1, %vm999_vm0  ;;  %v2461_v1 = vld [vmem:[%s3548_s5 + $0x74] sm:$0xf0] }
 0x1e9   :  { %v629_v49 = vmax.f32 %v617_v12, 0.0  ;;  %v983_v50 = vadd.s32 %v981_v9, %v979_v52  ;;  %v3596_v45 = vmov 0  ;;  %v1035_v11 = vadd.s32 48, %v901_v21 }
 0x1ea   :  { %v3597_v45 = vsel %vm3149_vm12, 4294967295, %v3596_v45  ;;  %v957_v53 = vshrl.u32 %v956_v57, 5  ;;  %v975_v59 = vshrl.u32 %v3104_v29, 16 }
 0x1eb   :  { %v1093_v3 = vsel %vm3093_vm2, %v629_v49, 0.0  ;;  %v984_v6 = vadd.s32 %v983_v50, %v973_v38  ;;  %v1047_v49 = vsel %vm3156_vm11, %v1035_v11, %v901_v21 }
 0x1ec   :  { %v1105_v40 = vrot.slane %v1093_v3, 7  ;;  %v1129_v10 = vrot.slane %v1093_v3, 1  ;;  %v586_v27 = vpop.f32.mrf.mxu1  ;;  %v958_v42 = vmul.u32 48, %v957_v53  ;;  %vm3175_vm8 = vcmp.lt.s32.totalorder %v1047_v49, 40 }
 0x1ed   :  { %v606_v5 = vmax.f32 %v2743_v39, %v586_v27  ;;  %v985_v29 = vadd.s32 %v984_v6, %v975_v59 }
 0x1ee   :  { %v1140_v36 = vsel %vm3558_vm4, %v1128_v54, %v1129_v10  ;;  %v3146_v55 = vsel %vm218_vm6, %v1104_v44, %v1105_v40  ;;  %v930_v44 = vsub.s32 %v2929_v31, %v929_v19 }
 0x1ef   :  { %v618_v39 = vadd.f32 %v606_v5, %v2837_v8  ;;  %v1309_v34 = vpack.c.bf16 %v1140_v36, %v1141_v16  ;;  %v986_v0 = vshrl.u32 %v985_v29, 5 }
 0x1f0   :  { %vm1000_vm0 = vcmp.ne.s32.totalorder %v930_v44, 0  ;;  %vm1012_vm1 = vcmp.lt.s32.totalorder %v930_v44, 0  ;;  %v1036_v62 = vadd.s32 48, %v930_v44 }
 0x1f1   :  { %v630_v12 = vmax.f32 %v618_v39, 0.0  ;;  %2204 = vmatmul.msk.bf16.gmra.mxu0 %vm3560_vm3, %v1309_v34  ;;  %vm3179_vm11 = vmand %vm1012_vm1, %vm1000_vm0  ;;  %v987_v50 = vmul.u32 48, %v986_v0 }
 0x1f2   :  { %v1048_v16 = vsel %vm3179_vm11, %v1036_v62, %v930_v44 }
 0x1f3   :  { %v1094_v2 = vsel %vm3149_vm12, %v630_v12, 0.0  ;;  %vm3196_vm7 = vcmp.lt.s32.totalorder %v1048_v16, 40  ;;  %v988_v41 = vsub.s32 %v3068_v30, %v987_v50 }
 0x1f4   :  { %v1106_v58 = vrot.slane %v1094_v2, 7  ;;  %v589_v61 = vpop.f32.mrf.mxu1  ;;  %v1161_v7 = vpack.c.bf16 %v1094_v2, %v1093_v3  ;;  %v1130_v3 = vrot.slane %v1094_v2, 1 }
 0x1f5   :  { %v607_v54 = vmax.f32 %v2752_v56, %v589_v61  ;;  %v1038_v49 = vadd.s32 48, %v988_v41  ;;  %v2278_v56 = vld [vmem:[%s3548_s5 + $0x38] sm:$0xf0] }
 0x1f6   :  { %2173 = vmatmul.msk.bf16.gmra.mxu2 %vm3560_vm3, %v1161_v7  ;;  %v3170_v31 = vsel %vm218_vm6, %v1105_v40, %v1106_v58  ;;  %v959_v40 = vsub.s32 %v3008_v46, %v958_v42  ;;  %v1139_v39 = vsel %vm3558_vm4, %v1129_v10, %v1130_v3 }
 0x1f7   :  { %v619_v32 = vadd.f32 %v607_v54, %v2837_v8  ;;  %v1150_v48 = vpack.c.bf16 %v3170_v31, %v3146_v55 }
 0x1f8   :  { %vm1001_vm0 = vcmp.ne.s32.totalorder %v959_v40, 0  ;;  %vm1013_vm1 = vcmp.lt.s32.totalorder %v959_v40, 0  ;;  %v1037_v11 = vadd.s32 48, %v959_v40 }
 0x1f9   :  { %v631_v21 = vmax.f32 %v619_v32, 0.0  ;;  %vm1025_vm11 = vmand %vm1013_vm1, %vm1001_vm0  ;;  %vm1014_vm0 = vcmp.lt.s32.totalorder %v988_v41, 0 }
 0x1fa   :  { %v1049_v6 = vsel %vm1025_vm11, %v1037_v11, %v959_v40  ;;  %vm3608_vm11 = vcmp.lt.s32.totalorder %v2610_v23, 7 }
 0x1fb   :  { %v1095_v27 = vsel %vm3175_vm8, %v631_v21, 0.0  ;;  %vm3209_vm1 = vcmp.lt.s32.totalorder %v1049_v6, 40 }
 0x1fc   :  { %v1107_v5 = vrot.slane %v1095_v27, 7  ;;  %v1131_v19 = vrot.slane %v1095_v27, 1  ;;  %v591_v9 = vpop.f32.mrf.mxu1 }
 0x1fd   :  { %v608_v36 = vmax.f32 %v2758_v13, %v591_v9  ;;  %v3610_v9 = vmov 0  ;;  %v2268_v13 = vld [vmem:[%s3548_s5 + $0x20] sm:$0xf] }
 0x1fe   :  { %v1138_v57 = vsel %vm3558_vm4, %v1130_v3, %v1131_v19  ;;  %v1114_v46 = vsel %vm218_vm6, %v1106_v58, %v1107_v5  ;;  %vm1002_vm4 = vcmp.ne.s32.totalorder %v988_v41, 0 }
 0x1ff   :  { %v620_v34 = vadd.f32 %v608_v36, %v2837_v8  ;;  %v1310_v38 = vpack.c.bf16 %v1138_v57, %v1139_v39  ;;  %vm1026_vm12 = vmand %vm1014_vm0, %vm1002_vm4  ;;  %vm3612_vm0 = vcmask 261120  }
 0x200   :  { %v1050_v3 = vsel %vm1026_vm12, %v1038_v49, %v988_v41  ;;  %vm3613_vm12 = vmmov %vm3612_vm0 }
 0x201   :  { %v632_v12 = vmax.f32 %v620_v34, 0.0  ;;  %2205 = vmatmul.msk.bf16.gmra.mxu0 %vm3560_vm3, %v1310_v38  ;;  %vm3223_vm4 = vcmp.lt.s32.totalorder %v1050_v3, 40 }
 0x202   :  { %v3611_v9 = vsel %vm3223_vm4, 4294967295, %v3610_v9 }
 0x203   :  { %v1096_v10 = vsel %vm3196_vm7, %v632_v12, 0.0 }
 0x204   :  { %v1108_v44 = vrot.slane %v1096_v10, 7  ;;  %v594_v53 = vpop.f32.mrf.mxu1  ;;  %v1162_v2 = vpack.c.bf16 %v1096_v10, %v1095_v27  ;;  %v1132_v42 = vrot.slane %v1096_v10, 1  ;;  %v3269_v10 = vld [vmem:[%s3546_s11 + $0x3] ss:$0 sm:$0xff] }
 0x205   :  { %v609_v59 = vmax.f32 %v2774_v51, %v594_v53 }
 0x206   :  { %2174 = vmatmul.msk.bf16.gmra.mxu2 %vm3560_vm3, %v1162_v2  ;;  %v1113_v58 = vsel %vm218_vm6, %v1107_v5, %v1108_v44  ;;  %vm3609_vm3 = vmmov %vm3608_vm11 }
 0x207   :  { %v621_v61 = vadd.f32 %v609_v59, %v2837_v8  ;;  %v1151_v7 = vpack.c.bf16 %v1113_v58, %v1114_v46  ;;  %v1137_v40 = vsel %vm3609_vm3, %v1131_v19, %v1132_v42  ;;  %vm3614_vm3 = vmmov %vm3612_vm0 }
 0x209   :  { %v633_v30 = vmax.f32 %v621_v61, 0.0 }
 0x20b   :  { %v1097_v51 = vsel %vm3209_vm1, %v633_v30, 0.0 }
 0x20c   :  { %v1109_v32 = vrot.slane %v1097_v51, 7  ;;  %v1133_v29 = vrot.slane %v1097_v51, 1  ;;  %v596_v21 = vpop.f32.mrf.mxu1 }
 0x20d   :  { %v610_v62 = vmax.f32 %v2790_v15, %v596_v21 }
 0x20e   :  { %v1136_v52 = vsel %vm3608_vm11, %v1132_v42, %v1133_v29  ;;  %v1112_v27 = vsel %vm218_vm6, %v1108_v44, %v1109_v32 }
 0x20f   :  { %v622_v0 = vadd.f32 %v610_v62, %v2837_v8  ;;  %v1311_v5 = vpack.c.bf16 %v1136_v52, %v1137_v40 }
 0x211   :  { %v634_v36 = vmax.f32 %v622_v0, 0.0  ;;  %2206 = vmatmul.msk.bf16.gmra.mxu0 %vm3612_vm0, %v1311_v5  ;;  %vm3615_vm0 = vmmov %vm3608_vm11 }
 0x213   :  { %v1098_v15 = vsel %vm3223_vm4, %v634_v36, 0.0  ;;  %vm3619_vm4 = vmmov %vm3614_vm3  ;;  %v2247_v36 = vor.u32 %v2460_v18, %v2244_v37 }
 0x214   :  { %v1110_v16 = vrot.slane %v1098_v15, 7  ;;  %v1163_v57 = vpack.c.bf16 %v1098_v15, %v1097_v51  ;;  %v1134_v34 = vrot.slane %v1098_v15, 1  ;;  %v2234_v15 = vld [vmem:[%s3548_s5 + $0x60] sm:$0xf] }
 0x215   :  { %1557 = vmatpush.bf16.msra.mxu3 %v2247_v36 }
 0x216   :  { %2175 = vmatmul.msk.bf16.gmra.mxu2 %vm3613_vm12, %v1163_v57  ;;  %v1122_v8 = vsel %vm218_vm6, %v1110_v16, %v1099_v20  ;;  %v1111_v19 = vsel %vm218_vm6, %v1109_v32, %v1110_v16  ;;  %v1135_v38 = vsel %vm3608_vm11, %v1133_v29, %v1134_v34  ;;  %v1146_v50 = vsel %vm3615_vm0, %v1134_v34, %v1123_v35  ;;  %vm3616_vm12 = vmmov %vm3614_vm3  ;;  %v2459_v16 = vld [vmem:[%s3548_s5 + $0x64] sm:$0xf0] }
 0x217   :  { %v1147_v39 = vpack.c.bf16 %v2940_v25, %v1122_v8  ;;  %v1152_v46 = vpack.c.bf16 %v1111_v19, %v1112_v27  ;;  %v1312_v12 = vpack.c.bf16 %v1146_v50, %v1135_v38  ;;  %vm3617_vm6 = vmmov %vm3614_vm3  ;;  %v2235_v19 = vor.u32 %v2459_v16, %v2234_v15 }
 0x218   :  { %vm3618_vm11 = vmmov %vm3614_vm3 }
 0x219   :  { %2184 = vmatmul.msk.bf16.vlgmr.msrb.gmra.mxu3 %vm3614_vm3, %v1147_v39  ;;  %vm3620_vm0 = vmmov %vm3614_vm3  ;;  %v2286_v39 = vld [vmem:[%s3549_s6] sm:$0xf] }
 0x221   :  { %2207 = vmatmul.msk.bf16.gmra.mxu0 %vm3616_vm12, %v1312_v12 }
 0x229   :  { %2185 = vmatmul.msk.bf16.gmra.mxu3 %vm3617_vm6, %v1148_v14  ;;  %v2242_v14 = vld [vmem:[%s3548_s5 + $0x70] sm:$0xf]  ;;  %vm3633_vm6 = vnez %v3611_v9  ;;  %v2446_v9 = vld [vmem:[%s3548_s5 + $0x4] sm:$0xf] }
 0x22a   :  { %v2243_v4 = vor.u32 %v2461_v1, %v2242_v14  ;;  %v2458_v1 = vld [vmem:[%s3548_s5 + $0x64] sm:$0xf] }
 0x22c   :  { %1544 = vmatpush.bf16.msra.mxu2 %v2243_v4  ;;  %v2236_v4 = vld [vmem:[%s3548_s5 + $0x68] sm:$0xf0] }
 0x230   :  { %1545 = vmatpush.bf16.msra.mxu2 %v2235_v19 }
 0x239   :  { %2186 = vmatmul.msk.bf16.gmra.mxu3 %vm3614_vm3, %v1149_v26 }
 0x249   :  { %2187 = vmatmul.msk.bf16.gmra.mxu3 %vm3618_vm11, %v1150_v48  ;;  %v1208_v23 = vpop.f32.mrf.mxu2  ;;  %vm1654_vm11 = vcmask 130048  }
 0x24e   :  { %v1357_v63 = vpop.f32.mrf.mxu0 }
 0x251   :  { %v1210_v20 = vpop.f32.mrf.mxu2 }
 0x256   :  { %v1359_v35 = vpop.f32.mrf.mxu0 }
 0x259   :  { %2188 = vmatmul.msk.bf16.gmra.mxu3 %vm3619_vm4, %v1151_v7  ;;  %v1213_v25 = vpop.f32.mrf.mxu2  ;;  %vm3621_vm4 = vcmask 523264  }
 0x25a   :  { %vm3622_vm12 = vmmov %vm3621_vm4 }
 0x25e   :  { %v1362_v22 = vpop.f32.mrf.mxu0 }
 0x261   :  { %v1215_v55 = vpop.f32.mrf.mxu2 }
 0x266   :  { %v1364_v48 = vpop.f32.mrf.mxu0 }
 0x269   :  { %2189 = vmatmul.msk.bf16.gmra.mxu3 %vm3620_vm0, %v1152_v46  ;;  %v1218_v2 = vpop.f32.mrf.mxu2  ;;  %v2463_v46 = vld [vmem:[%s3549_s6 + $0x4] sm:$0xf0]  ;;  %vm3635_vm0 = vcmask 1041409  }
 0x26a   :  { %v2287_v34 = vor.u32 %v2463_v46, %v2286_v39  ;;  %v2456_v39 = vld [vmem:[%s3548_s5 + $0x54] sm:$0xf]  ;;  %v2228_v46 = vld [vmem:[%s3548_s5 + $0x58] sm:$0xf0] }
 0x26c   :  { %1665 = vmatpush.bf16.msra.mxu0 %v2287_v34 }
 0x26e   :  { %v1367_v58 = vpop.f32.mrf.mxu0 }
 0x271   :  { %v1220_v62 = vpop.f32.mrf.mxu2 }
 0x276   :  { %v1369_v52 = vpop.f32.mrf.mxu0 }
 0x279   :  { %v1223_v12 = vpop.f32.mrf.mxu2 }
 0x29c   :  { %v1277_v28 = vpop.f32.mrf.mxu3 }
 0x29d   :  { %v1278_v26 = vadd.f32 %v1277_v28, %v1208_v23 }
 0x29f   :  { %v1387_v11 = vadd.f32 %v1357_v63, %v1278_v26  ;;  %v1372_v63 = vpop.f32.mrf.mxu0  ;;  %v2239_v26 = vor.u32 %v2458_v1, %v2236_v4 }
 0x2a1   :  { %v1399_v41 = vadd.f32 %v1387_v11, %v3269_v10  ;;  %1558 = vmatpush.bf16.msra.mxu3 %v2239_v26 }
 0x2a3   :  { %v1411_v59 = vmax.f32 %v1399_v41, 0.0  ;;  %v1225_v41 = vpop.f32.mrf.mxu2 }
 0x2a4   :  { %v1279_v31 = vpop.f32.mrf.mxu3 }
 0x2a5   :  { %v1423_v7 = vsel %vm2847_vm9, %v1411_v59, 0.0  ;;  %v1280_v3 = vadd.f32 %v1279_v31, %v1210_v20  ;;  %vm3623_vm9 = vmmov %vm3621_vm4 }
 0x2a6   :  { %v1435_v51 = vsel %vm3621_vm4, %v1423_v7, -inf  ;;  %v2226_v7 = vld [vmem:[%s3548_s5 + $0x50] sm:$0xf] }
 0x2a7   :  { %v1388_v0 = vadd.f32 %v1359_v35, %v1280_v3 }
 0x2a9   :  { %v1400_v38 = vadd.f32 %v1388_v0, %v3269_v10 }
 0x2ab   :  { %v1412_v35 = vmax.f32 %v1400_v38, 0.0 }
 0x2ac   :  { %v1282_v44 = vpop.f32.mrf.mxu3 }
 0x2ad   :  { %v1283_v53 = vadd.f32 %v1282_v44, %v1213_v25 }
 0x2af   :  { %v1389_v6 = vadd.f32 %v1362_v22, %v1283_v53 }
 0x2b1   :  { %v1401_v61 = vadd.f32 %v1389_v6, %v3269_v10  ;;  %v1374_v6 = vpop.f32.mrf.mxu0 }
 0x2b3   :  { %v1413_v30 = vmax.f32 %v1401_v61, 0.0 }
 0x2b4   :  { %v1284_v49 = vpop.f32.mrf.mxu3 }
 0x2b5   :  { %v1425_v42 = vsel %vm2869_vm14, %v1413_v30, 0.0  ;;  %v1285_v21 = vadd.f32 %v1284_v49, %v1215_v55  ;;  %v1424_v55 = vsel %vm2865_vm13, %v1412_v35, 0.0  ;;  %vm3624_vm14 = vmmov %vm3621_vm4  ;;  %v2457_v30 = vld [vmem:[%s3548_s5 + $0x54] sm:$0xf0]  ;;  %v2454_v35 = vld [vmem:[%s3548_s5 + $0x44] sm:$0xf] }
 0x2b6   :  { %v1437_v32 = vsel %vm3622_vm12, %v1425_v42, -inf  ;;  %v1436_v44 = vsel %vm3624_vm14, %v1424_v55, -inf  ;;  %vm3626_vm13 = vmmov %vm3621_vm4  ;;  %v2227_v49 = vor.u32 %v2457_v30, %v2226_v7  ;;  %v2451_v30 = vld [vmem:[%s3548_s5 + $0x24] sm:$0xf0] }
 0x2b7   :  { %v1438_v29 = vmax.f32 %v1435_v51, %v1437_v32  ;;  %v1390_v40 = vadd.f32 %v1364_v48, %v1285_v21  ;;  %v1228_v32 = vpop.f32.mrf.mxu2 }
 0x2b8   :  { %1546 = vmatpush.bf16.msra.mxu2 %v2227_v49  ;;  %v2450_v49 = vld [vmem:[%s3548_s5 + $0x24] sm:$0xf] }
 0x2b9   :  { %v1402_v57 = vadd.f32 %v1390_v40, %v3269_v10  ;;  %v1377_v60 = vpop.f32.mrf.mxu0 }
 0x2bb   :  { %v1414_v23 = vmax.f32 %v1402_v57, 0.0 }
 0x2bc   :  { %v1287_v27 = vpop.f32.mrf.mxu3 }
 0x2bd   :  { %v1288_v5 = vadd.f32 %v1287_v27, %v1218_v2  ;;  %v1426_v28 = vsel %vm2922_vm10, %v1414_v23, 0.0  ;;  %vm3625_vm10 = vmmov %vm3621_vm4  ;;  %v2455_v23 = vld [vmem:[%s3548_s5 + $0x44] sm:$0xf0] }
 0x2be   :  { %v1439_v24 = vsel %vm3623_vm9, %v1426_v28, -inf }
 0x2bf   :  { %v1391_v8 = vadd.f32 %v1367_v58, %v1288_v5  ;;  %v1440_v59 = vmax.f32 %v1436_v44, %v1439_v24 }
 0x2c1   :  { %v1403_v50 = vadd.f32 %v1391_v8, %v3269_v10  ;;  %v1379_v3 = vpop.f32.mrf.mxu0 }
 0x2c3   :  { %v1415_v25 = vmax.f32 %v1403_v50, 0.0  ;;  %v2231_v50 = vor.u32 %v2456_v39, %v2228_v46  ;;  %v2447_v39 = vld [vmem:[%s3548_s5 + $0x4] sm:$0xf0] }
 0x2c4   :  { %v1289_v20 = vpop.f32.mrf.mxu3 }
 0x2c5   :  { %v1290_v22 = vadd.f32 %v1289_v20, %v1220_v62  ;;  %v1427_v31 = vsel %vm3011_vm5, %v1415_v25, 0.0  ;;  %v1230_v62 = vpop.f32.mrf.mxu2  ;;  %v2220_v25 = vld [vmem:[%s3548_s5 + $0x48] sm:$0xf0]  ;;  %1559 = vmatpush.bf16.msra.mxu3 %v2231_v50  ;;  %vm3629_vm5 = vmmov %vm3621_vm4 }
 0x2c6   :  { %v1441_v53 = vsel %vm3625_vm10, %v1427_v31, -inf }
 0x2c7   :  { %v1392_v14 = vadd.f32 %v1369_v52, %v1290_v22  ;;  %v1442_v58 = vmax.f32 %v1438_v29, %v1441_v53  ;;  %v2223_v22 = vor.u32 %v2454_v35, %v2220_v25 }
 0x2c9   :  { %v1404_v48 = vadd.f32 %v1392_v14, %v3269_v10  ;;  %v1382_v15 = vpop.f32.mrf.mxu0  ;;  %1560 = vmatpush.bf16.msra.mxu3 %v2223_v22  ;;  %v1641_v22 = vld [vmem:[%s3550_s2] sm:$0x1] }
 0x2ca   :  { %2292 = vmatmul.msk.bf16.vlgmr.msra.gmra.mxu0 %vm1654_vm11, %v1641_v22 }
 0x2cb   :  { %v1416_v11 = vmax.f32 %v1404_v48, 0.0 }
 0x2cc   :  { %v1292_v2 = vpop.f32.mrf.mxu3 }
 0x2cd   :  { %v1428_v47 = vsel %vm3025_vm15, %v1416_v11, 0.0  ;;  %v1293_v29 = vadd.f32 %v1292_v2, %v1223_v12  ;;  %v1233_v18 = vpop.f32.mrf.mxu2  ;;  %v2218_v12 = vld [vmem:[%s3548_s5 + $0x40] sm:$0xf]  ;;  %vm3630_vm15 = vmmov %vm3621_vm4 }
 0x2ce   :  { %v1443_v33 = vsel %vm3626_vm13, %v1428_v47, -inf  ;;  %v2219_v20 = vor.u32 %v2455_v23, %v2218_v12  ;;  %v2276_v47 = vld [vmem:[%s3548_s5 + $0x30] sm:$0xf]  ;;  %vm3641_vm13 = vcmask 261120  }
 0x2cf   :  { %v1444_v61 = vmax.f32 %v1440_v59, %v1443_v33  ;;  %v1393_v0 = vadd.f32 %v1372_v63, %v1293_v29  ;;  %v2260_v29 = vld [vmem:[%s3548_s5 + $0x10] sm:$0xf] }
 0x2d0   :  { %1547 = vmatpush.bf16.msra.mxu2 %v2219_v20 }
 0x2d1   :  { %v1445_v42 = vmax.f32 %v1442_v58, %v1444_v61  ;;  %v1405_v57 = vadd.f32 %v1393_v0, %v3269_v10  ;;  %v1384_v53 = vpop.f32.mrf.mxu0  ;;  %v2452_v58 = vld [vmem:[%s3548_s5 + $0x34] sm:$0xf] }
 0x2d2   :  { %v2281_v7 = vor.u32 %v2452_v58, %v2278_v56  ;;  %v2467_v58 = vld [vmem:[%s3551_s7 + $0x18] sm:$0xff]  ;;  %v2478_v56 = vld [vmem:[%s3551_s7 + $0x70] sm:$0xff] }
 0x2d3   :  { %v1417_v28 = vmax.f32 %v1405_v57, 0.0  ;;  %v1446_v31 = vrot.slane %v1445_v42, 4 }
 0x2d4   :  { %v1294_v51 = vpop.f32.mrf.mxu3  ;;  %1632 = vmatpush.bf16.msrb.mxu3 %v2281_v7  ;;  %v2477_v7 = vld [vmem:[%s3551_s7 + $0x68] sm:$0xff] }
 0x2d5   :  { %v1295_v5 = vadd.f32 %v1294_v51, %v1225_v41  ;;  %v1235_v55 = vpop.f32.mrf.mxu2  ;;  %v1429_v24 = vsel %vm3093_vm2, %v1417_v28, 0.0  ;;  %v1447_v61 = vmax.f32 %v1445_v42, %v1446_v31  ;;  %v2270_v51 = vld [vmem:[%s3548_s5 + $0x28] sm:$0xf0]  ;;  %vm3631_vm2 = vmmov %vm3621_vm4 }
 0x2d6   :  { %v1452_v0 = vsel %vm3630_vm15, %v1429_v24, -inf  ;;  %v2288_v24 = vld [vmem:[%s3549_s6 + $0x8] sm:$0xf0] }
 0x2d7   :  { %v1394_v8 = vadd.f32 %v1374_v6, %v1295_v5  ;;  %v2453_v6 = vld [vmem:[%s3548_s5 + $0x34] sm:$0xf0] }
 0x2d8   :  { %v2277_v33 = vor.u32 %v2453_v6, %v2276_v47  ;;  %v1571_v47 = vpack.c.b16 %v2731_v17, %v2731_v17  ;;  %v2470_v6 = vld [vmem:[%s3551_s7 + $0x30] sm:$0xff]  ;;  %v2468_v17 = vld [vmem:[%s3551_s7 + $0x20] sm:$0xff] }
 0x2d9   :  { %v1406_v14 = vadd.f32 %v1394_v8, %v3269_v10 }
 0x2da   :  { %1619 = vmatpush.bf16.msrb.mxu2 %v2277_v33  ;;  %v2479_v33 = vld [vmem:[%s3551_s7 + $0x78] sm:$0xff] }
 0x2db   :  { %v1418_v11 = vmax.f32 %v1406_v14, 0.0  ;;  %1838 = vmatpush.bf16.msrb.mxu0 %v2479_v33 }
 0x2dc   :  { %v1297_v21 = vpop.f32.mrf.mxu3 }
 0x2dd   :  { %v1298_v40 = vadd.f32 %v1297_v21, %v1228_v32  ;;  %v2269_v21 = vor.u32 %v2451_v30, %v2268_v13 }
 0x2df   :  { %v1395_v37 = vadd.f32 %v1377_v60, %v1298_v40  ;;  %v2262_v40 = vld [vmem:[%s3548_s5 + $0x18] sm:$0xf0]  ;;  %1620 = vmatpush.bf16.msrb.mxu2 %v2269_v21  ;;  %1839 = vmatpush.bf16.msrb.mxu0 %v2478_v56  ;;  %v50_v56 = vld [vmem:[%s3546_s11 + $0x7] ss:$0 sm:$0xff] }
 0x2e1   :  { %v1407_v34 = vadd.f32 %v1395_v37, %v3269_v10 }
 0x2e3   :  { %v1419_v4 = vmax.f32 %v1407_v34, 0.0  ;;  %1840 = vmatpush.bf16.msrb.mxu0 %v2477_v7 }
 0x2e4   :  { %v1299_v52 = vpop.f32.mrf.mxu3 }
 0x2e5   :  { %v1300_v27 = vadd.f32 %v1299_v52, %v1230_v62  ;;  %v1431_v2 = vsel %vm3175_vm8, %v1419_v4, 0.0  ;;  %vm3628_vm8 = vmmov %vm3621_vm4  ;;  %v2273_v52 = vor.u32 %v2450_v49, %v2270_v51  ;;  %v2465_v49 = vld [vmem:[%s3551_s7 + $0x8] sm:$0xff]  ;;  %v2476_v51 = vld [vmem:[%s3551_s7 + $0x60] sm:$0xff] }
 0x2e6   :  { %v1454_v62 = vsel %vm3628_vm8, %v1431_v2, -inf }
 0x2e7   :  { %v1396_v36 = vadd.f32 %v1379_v3, %v1300_v27  ;;  %v1448_v27 = vrot.slane %v1447_v61, 2  ;;  %v1455_v37 = vmax.f32 %v1452_v0, %v1454_v62  ;;  %1633 = vmatpush.bf16.msrb.mxu3 %v2273_v52  ;;  %1841 = vmatpush.bf16.msrb.mxu0 %v2476_v51  ;;  %v2474_v62 = vld [vmem:[%s3551_s7 + $0x50] sm:$0xff] }
 0x2e8   :  { %v51_v51 = vld [vmem:[%s3546_s11 + $0x10] ss:$0 sm:$0xff] }
 0x2e9   :  { %v1408_v38 = vadd.f32 %v1396_v36, %v3269_v10  ;;  %v1449_v50 = vmax.f32 %v1447_v61, %v1448_v27  ;;  %v2466_v61 = vld [vmem:[%s3551_s7 + $0x10] sm:$0xff]  ;;  %v2485_v27 = vld [vmem:[%s3552_s8 + $0x28] sm:$0xff] }
 0x2eb   :  { %v1420_v26 = vmax.f32 %v1408_v38, 0.0  ;;  %v2254_v38 = vld [vmem:[%s3548_s5 + $0x8] sm:$0xf0]  ;;  %v1450_v35 = vrot.slane %v1449_v50, 1 }
 0x2ec   :  { %v1302_v16 = vpop.f32.mrf.mxu3 }
 0x2ed   :  { %v1303_v19 = vadd.f32 %v1302_v16, %v1233_v18  ;;  %v1432_v59 = vsel %vm3196_vm7, %v1420_v26, 0.0  ;;  %vm3627_vm7 = vnez %v3597_v45  ;;  %v2449_v45 = vld [vmem:[%s3548_s5 + $0x14] sm:$0xf0]  ;;  %v1451_v14 = vmax.f32 %v1449_v50, %v1450_v35  ;;  %v2482_v35 = vld [vmem:[%s3552_s8 + $0x10] sm:$0xff] }
 0x2ee   :  { %v1430_v32 = vsel %vm3627_vm7, %v1418_v11, 0.0  ;;  %v1456_v3 = vsel %vm3629_vm5, %v1432_v59, -inf  ;;  %v2261_v16 = vor.u32 %v2449_v45, %v2260_v29  ;;  %v2471_v59 = vld [vmem:[%s3551_s7 + $0x38] sm:$0xff]  ;;  %vm2019_vm7 = vcmask 1024  }
 0x2ef   :  { %v1397_v63 = vadd.f32 %v1382_v15, %v1303_v19  ;;  %v1453_v5 = vsel %vm3631_vm2, %v1430_v32, -inf  ;;  %v2252_v19 = vld [vmem:[%s3548_s5] sm:$0xf]  ;;  %v2487_v45 = vld [vmem:[%s3552_s8 + $0x38] sm:$0xff] }
 0x2f0   :  { %v1457_v36 = vmax.f32 %v1453_v5, %v1456_v3  ;;  %1621 = vmatpush.bf16.msrb.mxu2 %v2261_v16  ;;  %v2253_v23 = vor.u32 %v2447_v39, %v2252_v19  ;;  %v2464_v32 = vld [vmem:[%s3551_s7] sm:$0xff]  ;;  %v2473_v3 = vld [vmem:[%s3551_s7 + $0x48] sm:$0xff] }
 0x2f1   :  { %v1409_v1 = vadd.f32 %v1397_v63, %v3269_v10  ;;  %v2257_v63 = vor.u32 %v2446_v9, %v2254_v38 }
 0x2f3   :  { %v1421_v41 = vmax.f32 %v1409_v1, 0.0 }
 0x2f4   :  { %v1304_v48 = vpop.f32.mrf.mxu3  ;;  %1622 = vmatpush.bf16.msrb.mxu2 %v2253_v23 }
 0x2f5   :  { %v1305_v44 = vadd.f32 %v1304_v48, %v1235_v55  ;;  %v1433_v60 = vsel %vm3209_vm1, %v1421_v41, 0.0  ;;  %vm3632_vm1 = vmmov %vm3631_vm2  ;;  %v1479_v55 = vpack.c.bf16 %v1451_v14, %v1451_v14  ;;  %v2462_v48 = vld [vmem:[%s3549_s6 + $0x4] sm:$0xf]  ;;  %v2490_v14 = vld [vmem:[%s3553_s9 + $0x10] sm:$0xff] }
 0x2f6   :  { %v1458_v18 = vsel %vm3632_vm1, %v1433_v60, -inf  ;;  %vm3634_vm3 = vmmov %vm3632_vm1  ;;  %v2475_v60 = vld [vmem:[%s3551_s7 + $0x58] sm:$0xff] }
 0x2f7   :  { %v1398_v43 = vadd.f32 %v1384_v53, %v1305_v44  ;;  %v1459_v46 = vmax.f32 %v1455_v37, %v1458_v18  ;;  %v1492_v11 = vunpack.c.l.b16 %v1479_v55  ;;  %v2291_v53 = vor.u32 %v2462_v48, %v2288_v24  ;;  %vm3636_vm4 = vmmov %vm3632_vm1  ;;  %1842 = vmatpush.bf16.msrb.mxu0 %v2475_v60 }
 0x2f8   :  { %vm3637_vm12 = vmmov %vm3632_vm1 }
 0x2f9   :  { %v1410_v42 = vadd.f32 %v1398_v43, %v3269_v10  ;;  %v2448_v10 = vld [vmem:[%s3548_s5 + $0x14] sm:$0xf]  ;;  %vm3638_vm9 = vmmov %vm3632_vm1  ;;  %v2469_v43 = vld [vmem:[%s3551_s7 + $0x28] sm:$0xff] }
 0x2fa   :  { %v2265_v8 = vor.u32 %v2448_v10, %v2262_v40  ;;  %vm3639_vm14 = vmmov %vm3632_vm1  ;;  %v2486_v10 = vld [vmem:[%s3552_s8 + $0x30] sm:$0xff]  ;;  %v2025_v40 = vld [vmem:[%s3546_s11 + $0x4] ss:$8 sm:$0x3] }
 0x2fb   :  { %v1422_v54 = vmax.f32 %v1410_v42, 0.0  ;;  %1843 = vmatpush.bf16.msrb.mxu0 %v2474_v62  ;;  %v1687_v37 = vperm.slane %v2025_v40, 0  ;;  %vm3640_vm10 = vmmov %vm3632_vm1 }
 0x2fc   :  { %1634 = vmatpush.bf16.msrb.mxu3 %v2265_v8 }
 0x2fd   :  { %v1434_v15 = vsel %vm3633_vm6, %v1422_v54, 0.0  ;;  %v2472_v54 = vld [vmem:[%s3551_s7 + $0x40] sm:$0xff] }
 0x2fe   :  { %v1460_v57 = vsel %vm3634_vm3, %v1434_v15, -inf  ;;  %v2484_v15 = vld [vmem:[%s3552_s8 + $0x20] sm:$0xff] }
 0x2ff   :  { %v1461_v34 = vmax.f32 %v1457_v36, %v1460_v57  ;;  %1844 = vmatpush.bf16.msrb.mxu0 %v2473_v3 }
 0x300   :  { %1635 = vmatpush.bf16.msrb.mxu3 %v2257_v63 }
 0x301   :  { %v1462_v12 = vmax.f32 %v1459_v46, %v1461_v34  ;;  %v1688_v34 = vperm.slane %v2025_v40, 1 }
 0x303   :  { %v1463_v20 = vrot.slane %v1462_v12, 4  ;;  %1845 = vmatpush.bf16.msrb.mxu0 %v2472_v54 }
 0x305   :  { %v1464_v25 = vmax.f32 %v1462_v12, %v1463_v20  ;;  %v2483_v20 = vld [vmem:[%s3552_s8 + $0x18] sm:$0xff] }
 0x307   :  { %v1465_v28 = vrot.slane %v1464_v25, 2 }
 0x309   :  { %v1466_v1 = vmax.f32 %v1464_v25, %v1465_v28  ;;  %v2481_v25 = vld [vmem:[%s3552_s8 + $0x8] sm:$0xff]  ;;  %v2491_v28 = vld [vmem:[%s3553_s9 + $0x18] sm:$0xff] }
 0x30b   :  { %v1467_v4 = vrot.slane %v1466_v1, 1 }
 0x30d   :  { %v1468_v26 = vmax.f32 %v1466_v1, %v1467_v4  ;;  %v2489_v1 = vld [vmem:[%s3553_s9 + $0x8] sm:$0xff] }
 0x30f   :  { %v1480_v31 = vpack.c.bf16 %v1468_v26, %v1468_v26  ;;  %v48_v26 = vld [vmem:[%s3546_s11 + $0x5] ss:$0 sm:$0xff] }
 0x311   :  { %v1493_v41 = vunpack.c.l.b16 %v1480_v31 }
 0x313   :  { %v1495_v44 = vsel %vm3635_vm0, %v1493_v41, %v1492_v11 }
 0x314   :  { %v1496_v2 = vpack.c.b16 %v1495_v44, %v1495_v44 }
 0x316   :  { %2248 = vmatmul.msk.bf16.vlgmr.msra.gmra.mxu2 %vm3636_vm4, %v1496_v2  ;;  %2249 = vmatmul.msk.bf16.vlgmr.msra.gmra.mxu3 %vm3637_vm12, %v1496_v2  ;;  %v2493_v2 = vld [vmem:[%s3554_s10 + $0x8] sm:$0xff] }
 0x317   :  { %1678 = vmatpush.bf16.msra.mxu2 %v2291_v53  ;;  %1825 = vmatpush.bf16.msra.mxu3 %v2471_v59  ;;  %v2488_v53 = vld [vmem:[%s3553_s9] sm:$0xff] }
 0x318   :  { %2007 = vmatpush.bf16.msra.mxu0 %v2493_v2  ;;  %v2492_v59 = vld [vmem:[%s3554_s10] sm:$0xff] }
 0x31b   :  { %1826 = vmatpush.bf16.msra.mxu3 %v2470_v6 }
 0x31c   :  { %2008 = vmatpush.bf16.msra.mxu0 %v2492_v59 }
 0x31f   :  { %1827 = vmatpush.bf16.msra.mxu3 %v2469_v43 }
 0x323   :  { %1828 = vmatpush.bf16.msra.mxu3 %v2468_v17 }
 0x326   :  { %2282 = vmatmul.msk.bf16.vlgmr.msrb.gmra.mxu2 %vm3638_vm9, %v1571_v47  ;;  %2283 = vmatmul.msk.bf16.vlgmr.msrb.gmra.mxu3 %vm3639_vm14, %v1571_v47  ;;  %v49_v47 = vld [vmem:[%s3546_s11 + $0x6] ss:$0 sm:$0xff] }
 0x327   :  { %1829 = vmatpush.bf16.msra.mxu3 %v2467_v58  ;;  %1917 = vmatpush.bf16.msrb.mxu2 %v2487_v45 }
 0x32b   :  { %1830 = vmatpush.bf16.msra.mxu3 %v2466_v61  ;;  %1918 = vmatpush.bf16.msrb.mxu2 %v2486_v10 }
 0x32f   :  { %1831 = vmatpush.bf16.msra.mxu3 %v2465_v49  ;;  %1919 = vmatpush.bf16.msrb.mxu2 %v2485_v27 }
 0x333   :  { %1832 = vmatpush.bf16.msra.mxu3 %v2464_v32  ;;  %1920 = vmatpush.bf16.msrb.mxu2 %v2484_v15 }
 0x336   :  { %2293 = vmatmul.msk.bf16.vlgmr.msra.gmra.mxu2 %vm1654_vm11, %v1641_v22  ;;  %v2480_v22 = vld [vmem:[%s3552_s8] sm:$0xff] }
 0x337   :  { %1921 = vmatpush.bf16.msrb.mxu2 %v2483_v20  ;;  %1971 = vmatpush.bf16.msrb.mxu3 %v2491_v28 }
 0x33b   :  { %1922 = vmatpush.bf16.msrb.mxu2 %v2482_v35  ;;  %1972 = vmatpush.bf16.msrb.mxu3 %v2490_v14 }
 0x33f   :  { %1923 = vmatpush.bf16.msrb.mxu2 %v2481_v25  ;;  %1973 = vmatpush.bf16.msrb.mxu3 %v2489_v1 }
 0x343   :  { %1924 = vmatpush.bf16.msrb.mxu2 %v2480_v22  ;;  %1974 = vmatpush.bf16.msrb.mxu3 %v2488_v53 }
 0x347   :  { %v1667_v13 = vpop.f32.mrf.mxu0 }
 0x34f   :  { %v1669_v30 = vpop.f32.mrf.mxu0 }
 0x399   :  { %v1549_v42 = vpop.f32.mrf.mxu2  ;;  %v1562_v21 = vpop.f32.mrf.mxu3 }
 0x3a1   :  { %v1551_v52 = vpop.f32.mrf.mxu2  ;;  %v1564_v29 = vpop.f32.mrf.mxu3 }
 0x3a9   :  { %v1624_v0 = vpop.f32.mrf.mxu2  ;;  %v1637_v5 = vpop.f32.mrf.mxu3 }
 0x3aa   :  { %v1625_v18 = vadd.f32 %v1624_v0, %v1549_v42  ;;  %v1638_v46 = vadd.f32 %v1637_v5, %v1562_v21 }
 0x3ac   :  { %v1684_v36 = vadd.f32 %v1667_v13, %v1625_v18 }
 0x3ae   :  { %v1691_v16 = vadd.f32 %v1687_v37, %v1684_v36 }
 0x3b0   :  { %v1693_v57 = vmax.f32 %v1691_v16, 0.0 }
 0x3b1   :  { %v1626_v8 = vpop.f32.mrf.mxu2  ;;  %v1639_v19 = vpop.f32.mrf.mxu3 }
 0x3b2   :  { %v1695_v39 = vpack.c.bf16 %v1693_v57, %v1693_v57 }
 0x3b4   :  { %1833 = vmatmul.bf16.vlgmr.msra.gmra.mxu3 %v1695_v39 }
 0x3b9   :  { %v1680_v9 = vpop.f32.mrf.mxu2 }
 0x3ba   :  { %v1685_v38 = vadd.f32 %v1680_v9, %v1638_v46 }
 0x3bc   :  { %v1692_v50 = vadd.f32 %v1688_v34, %v1685_v38 }
 0x3be   :  { %v1694_v12 = vmax.f32 %v1692_v50, 0.0 }
 0x3c0   :  { %v1696_v23 = vpack.c.bf16 %v1694_v12, %v1694_v12 }
 0x3c1   :  { %v1682_v63 = vpop.f32.mrf.mxu2 }
 0x3c2   :  { %1846 = vmatmul.bf16.vlgmr.msrb.gmra.mxu0 %v1696_v23 }
 0x437   :  { %v1834_v4 = vpop.f32.mrf.mxu3 }
 0x438   :  { %v1835_v55 = vadd.f32 %v1834_v4, %v48_v26 }
 0x43f   :  { %v1836_v31 = vpop.f32.mrf.mxu3  ;;  %v1847_v48 = vpop.f32.mrf.mxu0 }
 0x440   :  { %v1848_v24 = vadd.f32 %v1847_v48, %v1835_v55 }
 0x442   :  { %v1851_v11 = vmax.f32 %v1848_v24, 0.0 }
 0x444   :  { %v1852_v41 = vpack.c.bf16 %v1851_v11, %v1851_v11 }
 0x446   :  { %1925 = vmatmul.bf16.vlgmr.msrb.gmra.mxu2 %v1852_v41 }
 0x447   :  { %v1849_v44 = vpop.f32.mrf.mxu0 }
 0x4c9   :  { %v1926_v6 = vpop.f32.mrf.mxu2 }
 0x4ca   :  { %v1927_v43 = vadd.f32 %v1926_v6, %v49_v47 }
 0x4cc   :  { %v1930_v17 = vmax.f32 %v1927_v43, 0.0 }
 0x4ce   :  { %v1931_v33 = vpack.c.bf16 %v1930_v17, %v1930_v17 }
 0x4d0   :  { %2406 = vmatmul.msk.bf16.vlgmr.msrb.gmra.mxu3 %vm3640_vm10, %v1931_v33 }
 0x4d1   :  { %v1928_v58 = vpop.f32.mrf.mxu2 }
 0x553   :  { %v1976_v13 = vpop.f32.mrf.mxu3 }
 0x554   :  { %v1977_v61 = vadd.f32 %v1976_v13, %v50_v56 }
 0x556   :  { %v1980_v7 = vmax.f32 %v1977_v61, 0.0 }
 0x558   :  { %v1981_v30 = vpack.c.bf16 %v1980_v7, %v1980_v7 }
 0x55a   :  { %2415 = vmatmul.msk.bf16.vlgmr.msra.gmra.mxu0 %vm3641_vm13, %v1981_v30 }
 0x55b   :  { %v1978_v49 = vpop.f32.mrf.mxu3 }
 0x5d7   :  { %v2010_v32 = vpop.f32.mrf.mxu0 }
 0x5d8   :  { %v2011_v60 = vadd.f32 %v2010_v32, %v51_v51 }
 0x5da   :  { %v2014_v42 = vsub.f32 0.0, %v2011_v60 }
 0x5dc   :  { %v2015_v21 = vmul.f32 1.442695, %v2014_v42 }
 0x5de   :  { %2495 = vpow2.f32 %v2015_v21 }
 0x5df   :  { %v2012_v62 = vpop.f32.mrf.mxu0 }
 0x5e4   :  { %v2496_v3 = vpop.eup %2495 }
 0x5e5   :  { %v2017_v52 = vadd.f32 1.0, %v2496_v3 }
 0x5e7   :  { %2497 = vrcp.f32 %v2017_v52 }
 0x5ed   :  { %v2498_v29 = vpop.eup %2497 }
 0x5ee   :  { %2020 = vst.msk [vmem:[%s3555_s12] sm:$0x3] %vm2019_vm7, %v2498_v29 }

</bundles_post_ra>
